<compile_context>
chip_gen: v5e
topology: v5e:2x2
jax: 0.10.0
libtpu: 0.0.40
codegen_flags: <defaults>
</compile_context>

<pallas_src>
import math

import jax
import jax.numpy as jnp
from jax.experimental import pallas as pl
from jax.experimental.pallas import tpu as pltpu

# ---- small synthetic DistilBERT config ----
VOCAB = 100
MAX_POS = 16
HIDDEN = 32
N_HEADS = 4
HEAD_DIM = HIDDEN // N_HEADS
FFN = 64
N_LAYERS = 2
NUM_CLASSES = 3
LN_EPS = 1e-12
LOGIT_PAD = 128            # lane-dense classifier output width (sliced outside)
VEC_ROWS = 8               # rows in the coalesced per-layer vector slab


def _ln(x, g, b):
    mu = jnp.mean(x, axis=-1, keepdims=True)
    var = jnp.mean((x - mu) ** 2, axis=-1, keepdims=True)
    return (x - mu) * jax.lax.rsqrt(var + LN_EPS) * g + b


def _split_heads(m):
    """(S, HIDDEN) -> (N_HEADS, S, HEAD_DIM) via lane slices + major-dim stack."""
    return jnp.stack(
        [m[:, h * HEAD_DIM:(h + 1) * HEAD_DIM] for h in range(N_HEADS)], axis=0)


# ---------------- fused Pallas kernel (one batch element per grid step) ----------------

def _fused_forward_kernel(x_ref, kb_ref, embln_ref,
                          wqkv_ref, wo_ref, w1_ref, w2_ref, vec_ref,
                          wc_ref, bc_ref, out_ref):
    x = _ln(x_ref[...], embln_ref[0:1, :], embln_ref[1:2, :])        # (S, H) f32
    s_len = x.shape[0]

    # per-key additive bias (0 for valid keys, -1e9 for padded keys), hoisted
    # broadcast: one (NH, S, S) slab reused by every layer of the static unroll.
    kb = kb_ref[0]                                                   # (1, S)
    kbias = jnp.broadcast_to(kb[None], (N_HEADS, s_len, s_len))      # (NH, S, S)
    # NOTE: an all-padded sequence degenerates to uniform attention (same class
    # of undefined behavior as the PyTorch reference).

    for l in range(N_LAYERS):                                        # static unroll
        vec = vec_ref[l]                                             # (8, 128) f32
        bqkv = vec[0:1, :3 * HIDDEN]      # 1/sqrt(HD) already folded into Q part
        bo = vec[1:2, :HIDDEN]
        g1 = vec[2:3, :HIDDEN]
        be1 = vec[3:4, :HIDDEN]
        b1 = vec[4:5, :FFN]
        b2 = vec[5:6, :HIDDEN]
        g2 = vec[6:7, :HIDDEN]
        be2 = vec[7:8, :HIDDEN]

        # fused Q|K|V projection: one lane-dense (S,32)@(32,96) matmul
        qkv = jnp.dot(x, wqkv_ref[l], preferred_element_type=jnp.float32) + bqkv
        q = _split_heads(qkv[:, 0 * HIDDEN:1 * HIDDEN])              # (NH, S, HD)
        k = _split_heads(qkv[:, 1 * HIDDEN:2 * HIDDEN])
        v = _split_heads(qkv[:, 2 * HIDDEN:3 * HIDDEN])

        # scores (scale pre-folded into wq/bq), softmax with EUP reciprocal
        # TODO(synk): at real DistilBERT dims (S=512, H=768) switch to a
        # flash-style query-block/key-block streaming softmax instead of
        # materializing the full (NH, S, S) score slab.
        s = jnp.einsum('hqd,hkd->hqk', q, k,
                       preferred_element_type=jnp.float32) + kbias
        m = jnp.max(s, axis=-1, keepdims=True)
        e = jnp.exp(s - m)
        p = e * pl.reciprocal(jnp.sum(e, axis=-1, keepdims=True), approx=True)

        ctx = jnp.einsum('hqk,hkd->hqd', p, v,
                         preferred_element_type=jnp.float32)         # (NH, S, HD)
        ctx_flat = jnp.concatenate([ctx[h] for h in range(N_HEADS)], axis=-1)
        attn = jnp.dot(ctx_flat, wo_ref[l],
                       preferred_element_type=jnp.float32) + bo      # (S, H)

        x = _ln(x + attn, g1, be1)

        h1 = jnp.dot(x, w1_ref[l], preferred_element_type=jnp.float32) + b1
        # TODO(synk): HF DistilBERT uses exact (erf) GELU; tanh approximation
        # kept for Mosaic-safe lowering.
        h1 = jax.nn.gelu(h1, approximate=True)
        ffn = jnp.dot(h1, w2_ref[l], preferred_element_type=jnp.float32) + b2

        x = _ln(x + ffn, g2, be2)

    # classifier on the CLS row only (row 0 of this sequence block),
    # lane-dense 128-wide padded output (sliced to NUM_CLASSES outside).
    cls = x[0:1, :]                                                  # (1, H)
    logits = jnp.dot(cls, wc_ref[...],
                     preferred_element_type=jnp.float32) + bc_ref[...]
    out_ref[...] = logits[None]                                      # (1, 1, 128)


# ---------------- pallas_call wrapper ----------------

def _fused_forward(x_emb, key_bias, packed, B, S):
    def const_spec(shape):
        nd = len(shape)
        return pl.BlockSpec(shape, lambda b, _nd=nd: (0,) * _nd)

    in_specs = [
        pl.BlockSpec((S, HIDDEN), lambda b: (b, 0)),        # per-batch rows
        pl.BlockSpec((1, 1, S), lambda b: (b, 0, 0)),       # per-batch key bias
    ] + [const_spec(op.shape) for op in packed]             # resident weights

    return pl.pallas_call(
        _fused_forward_kernel,
        out_shape=jax.ShapeDtypeStruct((B, 1, LOGIT_PAD), jnp.float32),
        grid=(B,),
        in_specs=in_specs,
        out_specs=pl.BlockSpec((1, 1, LOGIT_PAD), lambda b: (b, 0, 0)),
        compiler_params=pltpu.CompilerParams(dimension_semantics=("parallel",)),
    )(x_emb, key_bias, *packed)


# ---------------- parameters ----------------

def init_params(key):
    def norm(k, shape, scale=0.02):
        return (scale * jax.random.normal(k, shape)).astype(jnp.float32)

    keys = jax.random.split(key, 3 + N_LAYERS)
    params = {
        'word_emb': norm(keys[0], (VOCAB, HIDDEN)),
        'pos_emb': norm(keys[1], (MAX_POS, HIDDEN)),
        'emb_ln_g': jnp.ones((1, HIDDEN), jnp.float32),
        'emb_ln_b': jnp.zeros((1, HIDDEN), jnp.float32),
    }
    layers = []
    for l in range(N_LAYERS):
        lk = jax.random.split(keys[2 + l], 6)
        layers.append({
            'wq': norm(lk[0], (HIDDEN, HIDDEN)), 'bq': jnp.zeros((HIDDEN,), jnp.float32),
            'wk': norm(lk[1], (HIDDEN, HIDDEN)), 'bk': jnp.zeros((HIDDEN,), jnp.float32),
            'wv': norm(lk[2], (HIDDEN, HIDDEN)), 'bv': jnp.zeros((HIDDEN,), jnp.float32),
            'wo': norm(lk[3], (HIDDEN, HIDDEN)), 'bo': jnp.zeros((HIDDEN,), jnp.float32),
            'ln1_g': jnp.ones((HIDDEN,), jnp.float32), 'ln1_b': jnp.zeros((HIDDEN,), jnp.float32),
            'w1': norm(lk[4], (HIDDEN, FFN)), 'b1': jnp.zeros((FFN,), jnp.float32),
            'w2': norm(lk[5], (FFN, HIDDEN)), 'b2': jnp.zeros((HIDDEN,), jnp.float32),
            'ln2_g': jnp.ones((HIDDEN,), jnp.float32), 'ln2_b': jnp.zeros((HIDDEN,), jnp.float32),
        })
    params['layers'] = layers
    params['clf_w'] = norm(keys[2 + N_LAYERS], (HIDDEN, NUM_CLASSES))
    params['clf_b'] = jnp.zeros((NUM_CLASSES,), jnp.float32)
    return params


def _pack_params(params):
    """Wrapper-side layout plumbing: fuse Q|K|V weights (scale folded into Q),
    stack per-layer matrices, coalesce all small vectors (biases + LN params)
    into one (L, 8, 128) lane-dense slab, and pad the classifier to 128 lanes."""
    ls = params['layers']
    scale = jnp.float32(1.0 / math.sqrt(HEAD_DIM))

    wqkv = jnp.stack(
        [jnp.concatenate([l['wq'] * scale, l['wk'], l['wv']], axis=1) for l in ls])  # (L,H,3H)
    wo = jnp.stack([l['wo'] for l in ls])                                            # (L,H,H)
    w1 = jnp.stack([l['w1'] for l in ls])                                            # (L,H,FFN)
    w2 = jnp.stack([l['w2'] for l in ls])                                            # (L,FFN,H)

    def row(v):
        return jnp.zeros((LOGIT_PAD,), jnp.float32).at[:v.shape[0]].set(v)

    vecs = jnp.stack([
        jnp.stack([
            row(jnp.concatenate([l['bq'] * scale, l['bk'], l['bv']])),  # 0: fused QKV bias
            row(l['bo']),                                               # 1
            row(l['ln1_g']),                                            # 2
            row(l['ln1_b']),                                            # 3
            row(l['b1']),                                               # 4
            row(l['b2']),                                               # 5
            row(l['ln2_g']),                                            # 6
            row(l['ln2_b']),                                            # 7
        ]) for l in ls])                                                # (L, 8, 128)

    emb_ln = jnp.concatenate([params['emb_ln_g'], params['emb_ln_b']], axis=0)  # (2, H)

    wc = jnp.zeros((HIDDEN, LOGIT_PAD), jnp.float32).at[:, :NUM_CLASSES].set(params['clf_w'])
    bc = jnp.zeros((1, LOGIT_PAD), jnp.float32).at[:, :NUM_CLASSES].set(params['clf_b'])

    return (emb_ln, wqkv, wo, w1, w2, vecs, wc, bc)


# ---------------- forward ----------------

@jax.jit
def distilbert_sentiment_forward(params, input_ids, attention_mask):
    B, S = input_ids.shape
    # embedding gathers are glue (plain JAX); everything else runs in the kernel
    emb = params['word_emb'][input_ids] + params['pos_emb'][:S][None, :, :]
    x_emb = emb.reshape(B * S, HIDDEN).astype(jnp.float32)

    # O(B*S) per-key additive bias (0 = attend, -1e9 = padded key); per-batch
    # grid means no cross-batch masking is needed at all.
    key_bias = jnp.where(attention_mask > 0, 0.0, -1e9).astype(jnp.float32)
    key_bias = key_bias.reshape(B, 1, S)

    packed = _pack_params(params)
    out = _fused_forward(x_emb, key_bias, packed, B, S)      # (B, 1, 128)

    # last_hidden_state[:, 0, :] -> dropout(identity at inference) -> classifier
    return out[:, 0, :NUM_CLASSES]


if __name__ == "__main__":
    key = jax.random.PRNGKey(0)
    pkey, ikey = jax.random.split(key)
    params = init_params(pkey)

    B, S = 2, 8
    input_ids = jax.random.randint(ikey, (B, S), 0, VOCAB, dtype=jnp.int32)
    attention_mask = jnp.ones((B, S), jnp.int32).at[1, 6:].set(0)   # pad tail of row 1

    logits = distilbert_sentiment_forward(params, input_ids, attention_mask)
    jax.block_until_ready(logits)
    assert logits.shape == (B, NUM_CLASSES) and logits.dtype == jnp.float32
    print("KERNEL_OK")
</pallas_src>

<mosaic_0001>
module attributes {stable_mosaic.version = 11 : i64} {
  func.func @_fused_forward_kernel(%arg0: i32, %arg1: memref<8x32xf32, #tpu.memory_space<vmem>>, %arg2: memref<1x1x8xf32, #tpu.memory_space<vmem>>, %arg3: memref<2x32xf32, #tpu.memory_space<vmem>>, %arg4: memref<2x32x96xf32, #tpu.memory_space<vmem>>, %arg5: memref<2x32x32xf32, #tpu.memory_space<vmem>>, %arg6: memref<2x32x64xf32, #tpu.memory_space<vmem>>, %arg7: memref<2x64x32xf32, #tpu.memory_space<vmem>>, %arg8: memref<2x8x128xf32, #tpu.memory_space<vmem>>, %arg9: memref<32x128xf32, #tpu.memory_space<vmem>>, %arg10: memref<1x128xf32, #tpu.memory_space<vmem>>, %arg11: memref<1x1x128xf32, #tpu.memory_space<vmem>>) attributes {dimension_semantics = [#tpu.dimension_semantics<parallel>], iteration_bounds = array<i64: 2>, scalar_prefetch = 0 : i64, scratch_operands = 0 : i64, tpu.core_type = #tpu.core_type<tc>, window_params = [{transform_indices = @transform_0, window_bounds = array<i64: 8, 32>}, {transform_indices = @transform_1, window_bounds = array<i64: 1, 1, 8>}, {pipeline_mode = #tpu.pipeline_mode<synchronous>, transform_indices = @transform_2, window_bounds = array<i64: 2, 32>}, {pipeline_mode = #tpu.pipeline_mode<synchronous>, transform_indices = @transform_3, window_bounds = array<i64: 2, 32, 96>}, {pipeline_mode = #tpu.pipeline_mode<synchronous>, transform_indices = @transform_4, window_bounds = array<i64: 2, 32, 32>}, {pipeline_mode = #tpu.pipeline_mode<synchronous>, transform_indices = @transform_5, window_bounds = array<i64: 2, 32, 64>}, {pipeline_mode = #tpu.pipeline_mode<synchronous>, transform_indices = @transform_6, window_bounds = array<i64: 2, 64, 32>}, {pipeline_mode = #tpu.pipeline_mode<synchronous>, transform_indices = @transform_7, window_bounds = array<i64: 2, 8, 128>}, {pipeline_mode = #tpu.pipeline_mode<synchronous>, transform_indices = @transform_8, window_bounds = array<i64: 32, 128>}, {pipeline_mode = #tpu.pipeline_mode<synchronous>, transform_indices = @transform_9, window_bounds = array<i64: 1, 128>}, {transform_indices = @transform_10, window_bounds = array<i64: 1, 1, 128>}]} {
    %c0 = arith.constant 0 : index
    %c0_0 = arith.constant 0 : index
    %0 = vector.load %arg1[%c0, %c0_0] : memref<8x32xf32, #tpu.memory_space<vmem>>, vector<8x32xf32>
    %c0_1 = arith.constant 0 : index
    %c0_2 = arith.constant 0 : index
    %1 = vector.load %arg3[%c0_1, %c0_2] : memref<2x32xf32, #tpu.memory_space<vmem>>, vector<1x32xf32>
    %c1 = arith.constant 1 : index
    %c0_3 = arith.constant 0 : index
    %2 = vector.load %arg3[%c1, %c0_3] : memref<2x32xf32, #tpu.memory_space<vmem>>, vector<1x32xf32>
    %cst = arith.constant dense<0.000000e+00> : vector<8xf32>
    %3 = vector.multi_reduction <add>, %0, %cst [1] : vector<8x32xf32> to vector<8xf32>
    %4 = vector.shape_cast %3 : vector<8xf32> to vector<8x1xf32>
    %cst_4 = arith.constant 3.200000e+01 : f32
    %5 = vector.broadcast %cst_4 : f32 to vector<8x1xf32>
    %6 = arith.divf %4, %5 : vector<8x1xf32>
    %7 = vector.broadcast %6 : vector<8x1xf32> to vector<8x32xf32>
    %8 = arith.subf %0, %7 : vector<8x32xf32>
    %9 = arith.mulf %8, %8 : vector<8x32xf32>
    %cst_5 = arith.constant dense<0.000000e+00> : vector<8xf32>
    %10 = vector.multi_reduction <add>, %9, %cst_5 [1] : vector<8x32xf32> to vector<8xf32>
    %11 = vector.shape_cast %10 : vector<8xf32> to vector<8x1xf32>
    %cst_6 = arith.constant 3.200000e+01 : f32
    %12 = vector.broadcast %cst_6 : f32 to vector<8x1xf32>
    %13 = arith.divf %11, %12 : vector<8x1xf32>
    %14 = vector.broadcast %6 : vector<8x1xf32> to vector<8x32xf32>
    %15 = arith.subf %0, %14 : vector<8x32xf32>
    %cst_7 = arith.constant 9.99999996E-13 : f32
    %16 = vector.broadcast %cst_7 : f32 to vector<8x1xf32>
    %17 = arith.addf %13, %16 : vector<8x1xf32>
    %18 = math.rsqrt %17 : vector<8x1xf32>
    %19 = vector.broadcast %18 : vector<8x1xf32> to vector<8x32xf32>
    %20 = arith.mulf %15, %19 : vector<8x32xf32>
    %21 = vector.broadcast %1 : vector<1x32xf32> to vector<8x32xf32>
    %22 = arith.mulf %20, %21 : vector<8x32xf32>
    %23 = vector.broadcast %2 : vector<1x32xf32> to vector<8x32xf32>
    %24 = arith.addf %22, %23 : vector<8x32xf32>
    %c0_8 = arith.constant 0 : index
    %c0_9 = arith.constant 0 : index
    %c0_10 = arith.constant 0 : index
    %25 = vector.load %arg2[%c0_8, %c0_9, %c0_10] : memref<1x1x8xf32, #tpu.memory_space<vmem>>, vector<1x1x8xf32>
    %26 = vector.shape_cast %25 : vector<1x1x8xf32> to vector<1x8xf32>
    %27 = vector.shape_cast %26 : vector<1x8xf32> to vector<1x1x8xf32>
    %28 = vector.shape_cast %27 : vector<1x1x8xf32> to vector<1x1x8xf32>
    %29 = vector.broadcast %28 : vector<1x1x8xf32> to vector<4x8x8xf32>
    %c0_11 = arith.constant 0 : index
    %c0_12 = arith.constant 0 : index
    %c0_13 = arith.constant 0 : index
    %30 = vector.load %arg8[%c0_11, %c0_12, %c0_13] : memref<2x8x128xf32, #tpu.memory_space<vmem>>, vector<1x8x128xf32>
    %31 = vector.shape_cast %30 : vector<1x8x128xf32> to vector<8x128xf32>
    %32 = vector.extract_strided_slice %31 {offsets = [0, 0], sizes = [1, 96], strides = [1, 1]} : vector<8x128xf32> to vector<1x96xf32>
    %33 = vector.extract_strided_slice %31 {offsets = [1, 0], sizes = [1, 32], strides = [1, 1]} : vector<8x128xf32> to vector<1x32xf32>
    %34 = vector.extract_strided_slice %31 {offsets = [2, 0], sizes = [1, 32], strides = [1, 1]} : vector<8x128xf32> to vector<1x32xf32>
    %35 = vector.extract_strided_slice %31 {offsets = [3, 0], sizes = [1, 32], strides = [1, 1]} : vector<8x128xf32> to vector<1x32xf32>
    %36 = vector.extract_strided_slice %31 {offsets = [4, 0], sizes = [1, 64], strides = [1, 1]} : vector<8x128xf32> to vector<1x64xf32>
    %37 = vector.extract_strided_slice %31 {offsets = [5, 0], sizes = [1, 32], strides = [1, 1]} : vector<8x128xf32> to vector<1x32xf32>
    %38 = vector.extract_strided_slice %31 {offsets = [6, 0], sizes = [1, 32], strides = [1, 1]} : vector<8x128xf32> to vector<1x32xf32>
    %39 = vector.extract_strided_slice %31 {offsets = [7, 0], sizes = [1, 32], strides = [1, 1]} : vector<8x128xf32> to vector<1x32xf32>
    %c0_14 = arith.constant 0 : index
    %c0_15 = arith.constant 0 : index
    %c0_16 = arith.constant 0 : index
    %40 = vector.load %arg4[%c0_14, %c0_15, %c0_16] : memref<2x32x96xf32, #tpu.memory_space<vmem>>, vector<1x32x96xf32>
    %41 = vector.shape_cast %40 : vector<1x32x96xf32> to vector<32x96xf32>
    %cst_17 = arith.constant dense<0.000000e+00> : vector<8x96xf32>
    %42 = tpu.matmul %24, %41, %cst_17 {dimension_numbers = #tpu.dot_dimension_numbers<[1], [0], [0], [1], [0, 0, 1, 1], [], []>} : vector<8x32xf32>, vector<32x96xf32>, vector<8x96xf32> -> vector<8x96xf32>
    %43 = vector.broadcast %32 : vector<1x96xf32> to vector<8x96xf32>
    %44 = arith.addf %42, %43 : vector<8x96xf32>
    %45 = vector.extract_strided_slice %44 {offsets = [0, 0], sizes = [8, 32], strides = [1, 1]} : vector<8x96xf32> to vector<8x32xf32>
    %46 = vector.extract_strided_slice %45 {offsets = [0, 0], sizes = [8, 8], strides = [1, 1]} : vector<8x32xf32> to vector<8x8xf32>
    %47 = vector.extract_strided_slice %45 {offsets = [0, 8], sizes = [8, 8], strides = [1, 1]} : vector<8x32xf32> to vector<8x8xf32>
    %48 = vector.extract_strided_slice %45 {offsets = [0, 16], sizes = [8, 8], strides = [1, 1]} : vector<8x32xf32> to vector<8x8xf32>
    %49 = vector.extract_strided_slice %45 {offsets = [0, 24], sizes = [8, 8], strides = [1, 1]} : vector<8x32xf32> to vector<8x8xf32>
    %50 = vector.shape_cast %46 : vector<8x8xf32> to vector<1x8x8xf32>
    %51 = vector.shape_cast %47 : vector<8x8xf32> to vector<1x8x8xf32>
    %52 = vector.shape_cast %48 : vector<8x8xf32> to vector<1x8x8xf32>
    %53 = vector.shape_cast %49 : vector<8x8xf32> to vector<1x8x8xf32>
    %54 = tpu.concatenate %50, %51, %52, %53 in 0 : vector<1x8x8xf32>, vector<1x8x8xf32>, vector<1x8x8xf32>, vector<1x8x8xf32> -> vector<4x8x8xf32>
    %55 = vector.extract_strided_slice %44 {offsets = [0, 32], sizes = [8, 32], strides = [1, 1]} : vector<8x96xf32> to vector<8x32xf32>
    %56 = vector.extract_strided_slice %55 {offsets = [0, 0], sizes = [8, 8], strides = [1, 1]} : vector<8x32xf32> to vector<8x8xf32>
    %57 = vector.extract_strided_slice %55 {offsets = [0, 8], sizes = [8, 8], strides = [1, 1]} : vector<8x32xf32> to vector<8x8xf32>
    %58 = vector.extract_strided_slice %55 {offsets = [0, 16], sizes = [8, 8], strides = [1, 1]} : vector<8x32xf32> to vector<8x8xf32>
    %59 = vector.extract_strided_slice %55 {offsets = [0, 24], sizes = [8, 8], strides = [1, 1]} : vector<8x32xf32> to vector<8x8xf32>
    %60 = vector.shape_cast %56 : vector<8x8xf32> to vector<1x8x8xf32>
    %61 = vector.shape_cast %57 : vector<8x8xf32> to vector<1x8x8xf32>
    %62 = vector.shape_cast %58 : vector<8x8xf32> to vector<1x8x8xf32>
    %63 = vector.shape_cast %59 : vector<8x8xf32> to vector<1x8x8xf32>
    %64 = tpu.concatenate %60, %61, %62, %63 in 0 : vector<1x8x8xf32>, vector<1x8x8xf32>, vector<1x8x8xf32>, vector<1x8x8xf32> -> vector<4x8x8xf32>
    %65 = vector.extract_strided_slice %44 {offsets = [0, 64], sizes = [8, 32], strides = [1, 1]} : vector<8x96xf32> to vector<8x32xf32>
    %66 = vector.extract_strided_slice %65 {offsets = [0, 0], sizes = [8, 8], strides = [1, 1]} : vector<8x32xf32> to vector<8x8xf32>
    %67 = vector.extract_strided_slice %65 {offsets = [0, 8], sizes = [8, 8], strides = [1, 1]} : vector<8x32xf32> to vector<8x8xf32>
    %68 = vector.extract_strided_slice %65 {offsets = [0, 16], sizes = [8, 8], strides = [1, 1]} : vector<8x32xf32> to vector<8x8xf32>
    %69 = vector.extract_strided_slice %65 {offsets = [0, 24], sizes = [8, 8], strides = [1, 1]} : vector<8x32xf32> to vector<8x8xf32>
    %70 = vector.shape_cast %66 : vector<8x8xf32> to vector<1x8x8xf32>
    %71 = vector.shape_cast %67 : vector<8x8xf32> to vector<1x8x8xf32>
    %72 = vector.shape_cast %68 : vector<8x8xf32> to vector<1x8x8xf32>
    %73 = vector.shape_cast %69 : vector<8x8xf32> to vector<1x8x8xf32>
    %74 = tpu.concatenate %70, %71, %72, %73 in 0 : vector<1x8x8xf32>, vector<1x8x8xf32>, vector<1x8x8xf32>, vector<1x8x8xf32> -> vector<4x8x8xf32>
    "tpu.trace_start"() <{level = 10 : i32, message = "hqd,hkd->hqk"}> : () -> ()
    %cst_18 = arith.constant dense<0.000000e+00> : vector<4x8x8xf32>
    %75 = tpu.matmul %54, %64, %cst_18 {dimension_numbers = #tpu.dot_dimension_numbers<[2], [2], [1], [1], [0, 0, 0, 1, 1, 1], [0], [0]>} : vector<4x8x8xf32>, vector<4x8x8xf32>, vector<4x8x8xf32> -> vector<4x8x8xf32>
    "tpu.trace_stop"() : () -> ()
    %76 = arith.addf %75, %29 : vector<4x8x8xf32>
    %cst_19 = arith.constant dense<0xFF800000> : vector<4x8xf32>
    %77 = vector.multi_reduction <maximumf>, %76, %cst_19 [2] : vector<4x8x8xf32> to vector<4x8xf32>
    %78 = vector.shape_cast %77 : vector<4x8xf32> to vector<4x8x1xf32>
    %79 = vector.broadcast %78 : vector<4x8x1xf32> to vector<4x8x8xf32>
    %80 = arith.subf %76, %79 : vector<4x8x8xf32>
    %81 = math.exp %80 : vector<4x8x8xf32>
    %cst_20 = arith.constant dense<0.000000e+00> : vector<4x8xf32>
    %82 = vector.multi_reduction <add>, %81, %cst_20 [2] : vector<4x8x8xf32> to vector<4x8xf32>
    %83 = vector.shape_cast %82 : vector<4x8xf32> to vector<4x8x1xf32>
    %84 = tpu.reciprocal %83 {approx = true} : vector<4x8x1xf32> -> vector<4x8x1xf32>
    %85 = vector.broadcast %84 : vector<4x8x1xf32> to vector<4x8x8xf32>
    %86 = arith.mulf %81, %85 : vector<4x8x8xf32>
    "tpu.trace_start"() <{level = 10 : i32, message = "hqk,hkd->hqd"}> : () -> ()
    %cst_21 = arith.constant dense<0.000000e+00> : vector<4x8x8xf32>
    %87 = tpu.matmul %86, %74, %cst_21 {dimension_numbers = #tpu.dot_dimension_numbers<[2], [1], [1], [2], [0, 0, 0, 1, 1, 2], [0], [0]>} : vector<4x8x8xf32>, vector<4x8x8xf32>, vector<4x8x8xf32> -> vector<4x8x8xf32>
    "tpu.trace_stop"() : () -> ()
    %88 = vector.extract_strided_slice %87 {offsets = [0, 0, 0], sizes = [1, 8, 8], strides = [1, 1, 1]} : vector<4x8x8xf32> to vector<1x8x8xf32>
    %89 = vector.shape_cast %88 : vector<1x8x8xf32> to vector<8x8xf32>
    %90 = vector.extract_strided_slice %87 {offsets = [1, 0, 0], sizes = [1, 8, 8], strides = [1, 1, 1]} : vector<4x8x8xf32> to vector<1x8x8xf32>
    %91 = vector.shape_cast %90 : vector<1x8x8xf32> to vector<8x8xf32>
    %92 = vector.extract_strided_slice %87 {offsets = [2, 0, 0], sizes = [1, 8, 8], strides = [1, 1, 1]} : vector<4x8x8xf32> to vector<1x8x8xf32>
    %93 = vector.shape_cast %92 : vector<1x8x8xf32> to vector<8x8xf32>
    %94 = vector.extract_strided_slice %87 {offsets = [3, 0, 0], sizes = [1, 8, 8], strides = [1, 1, 1]} : vector<4x8x8xf32> to vector<1x8x8xf32>
    %95 = vector.shape_cast %94 : vector<1x8x8xf32> to vector<8x8xf32>
    %96 = tpu.concatenate %89, %91, %93, %95 in 1 : vector<8x8xf32>, vector<8x8xf32>, vector<8x8xf32>, vector<8x8xf32> -> vector<8x32xf32>
    %c0_22 = arith.constant 0 : index
    %c0_23 = arith.constant 0 : index
    %c0_24 = arith.constant 0 : index
    %97 = vector.load %arg5[%c0_22, %c0_23, %c0_24] : memref<2x32x32xf32, #tpu.memory_space<vmem>>, vector<1x32x32xf32>
    %98 = vector.shape_cast %97 : vector<1x32x32xf32> to vector<32x32xf32>
    %cst_25 = arith.constant dense<0.000000e+00> : vector<8x32xf32>
    %99 = tpu.matmul %96, %98, %cst_25 {dimension_numbers = #tpu.dot_dimension_numbers<[1], [0], [0], [1], [0, 0, 1, 1], [], []>} : vector<8x32xf32>, vector<32x32xf32>, vector<8x32xf32> -> vector<8x32xf32>
    %100 = vector.broadcast %33 : vector<1x32xf32> to vector<8x32xf32>
    %101 = arith.addf %99, %100 : vector<8x32xf32>
    %102 = arith.addf %24, %101 : vector<8x32xf32>
    %cst_26 = arith.constant dense<0.000000e+00> : vector<8xf32>
    %103 = vector.multi_reduction <add>, %102, %cst_26 [1] : vector<8x32xf32> to vector<8xf32>
    %104 = vector.shape_cast %103 : vector<8xf32> to vector<8x1xf32>
    %cst_27 = arith.constant 3.200000e+01 : f32
    %105 = vector.broadcast %cst_27 : f32 to vector<8x1xf32>
    %106 = arith.divf %104, %105 : vector<8x1xf32>
    %107 = vector.broadcast %106 : vector<8x1xf32> to vector<8x32xf32>
    %108 = arith.subf %102, %107 : vector<8x32xf32>
    %109 = arith.mulf %108, %108 : vector<8x32xf32>
    %cst_28 = arith.constant dense<0.000000e+00> : vector<8xf32>
    %110 = vector.multi_reduction <add>, %109, %cst_28 [1] : vector<8x32xf32> to vector<8xf32>
    %111 = vector.shape_cast %110 : vector<8xf32> to vector<8x1xf32>
    %cst_29 = arith.constant 3.200000e+01 : f32
    %112 = vector.broadcast %cst_29 : f32 to vector<8x1xf32>
    %113 = arith.divf %111, %112 : vector<8x1xf32>
    %114 = vector.broadcast %106 : vector<8x1xf32> to vector<8x32xf32>
    %115 = arith.subf %102, %114 : vector<8x32xf32>
    %cst_30 = arith.constant 9.99999996E-13 : f32
    %116 = vector.broadcast %cst_30 : f32 to vector<8x1xf32>
    %117 = arith.addf %113, %116 : vector<8x1xf32>
    %118 = math.rsqrt %117 : vector<8x1xf32>
    %119 = vector.broadcast %118 : vector<8x1xf32> to vector<8x32xf32>
    %120 = arith.mulf %115, %119 : vector<8x32xf32>
    %121 = vector.broadcast %34 : vector<1x32xf32> to vector<8x32xf32>
    %122 = arith.mulf %120, %121 : vector<8x32xf32>
    %123 = vector.broadcast %35 : vector<1x32xf32> to vector<8x32xf32>
    %124 = arith.addf %122, %123 : vector<8x32xf32>
    %c0_31 = arith.constant 0 : index
    %c0_32 = arith.constant 0 : index
    %c0_33 = arith.constant 0 : index
    %125 = vector.load %arg6[%c0_31, %c0_32, %c0_33] : memref<2x32x64xf32, #tpu.memory_space<vmem>>, vector<1x32x64xf32>
    %126 = vector.shape_cast %125 : vector<1x32x64xf32> to vector<32x64xf32>
    %cst_34 = arith.constant dense<0.000000e+00> : vector<8x64xf32>
    %127 = tpu.matmul %124, %126, %cst_34 {dimension_numbers = #tpu.dot_dimension_numbers<[1], [0], [0], [1], [0, 0, 1, 1], [], []>} : vector<8x32xf32>, vector<32x64xf32>, vector<8x64xf32> -> vector<8x64xf32>
    %128 = vector.broadcast %36 : vector<1x64xf32> to vector<8x64xf32>
    %129 = arith.addf %127, %128 : vector<8x64xf32>
    %130 = arith.mulf %129, %129 : vector<8x64xf32>
    %131 = arith.mulf %129, %130 : vector<8x64xf32>
    %cst_35 = arith.constant 4.471500e-02 : f32
    %132 = vector.broadcast %cst_35 : f32 to vector<8x64xf32>
    %133 = arith.mulf %132, %131 : vector<8x64xf32>
    %134 = arith.addf %129, %133 : vector<8x64xf32>
    %cst_36 = arith.constant 0.797884583 : f32
    %135 = vector.broadcast %cst_36 : f32 to vector<8x64xf32>
    %136 = arith.mulf %135, %134 : vector<8x64xf32>
    %137 = math.tanh %136 : vector<8x64xf32>
    %cst_37 = arith.constant 1.000000e+00 : f32
    %138 = vector.broadcast %cst_37 : f32 to vector<8x64xf32>
    %139 = arith.addf %138, %137 : vector<8x64xf32>
    %cst_38 = arith.constant 5.000000e-01 : f32
    %140 = vector.broadcast %cst_38 : f32 to vector<8x64xf32>
    %141 = arith.mulf %140, %139 : vector<8x64xf32>
    %142 = arith.mulf %129, %141 : vector<8x64xf32>
    %c0_39 = arith.constant 0 : index
    %c0_40 = arith.constant 0 : index
    %c0_41 = arith.constant 0 : index
    %143 = vector.load %arg7[%c0_39, %c0_40, %c0_41] : memref<2x64x32xf32, #tpu.memory_space<vmem>>, vector<1x64x32xf32>
    %144 = vector.shape_cast %143 : vector<1x64x32xf32> to vector<64x32xf32>
    %cst_42 = arith.constant dense<0.000000e+00> : vector<8x32xf32>
    %145 = tpu.matmul %142, %144, %cst_42 {dimension_numbers = #tpu.dot_dimension_numbers<[1], [0], [0], [1], [0, 0, 1, 1], [], []>} : vector<8x64xf32>, vector<64x32xf32>, vector<8x32xf32> -> vector<8x32xf32>
    %146 = vector.broadcast %37 : vector<1x32xf32> to vector<8x32xf32>
    %147 = arith.addf %145, %146 : vector<8x32xf32>
    %148 = arith.addf %124, %147 : vector<8x32xf32>
    %cst_43 = arith.constant dense<0.000000e+00> : vector<8xf32>
    %149 = vector.multi_reduction <add>, %148, %cst_43 [1] : vector<8x32xf32> to vector<8xf32>
    %150 = vector.shape_cast %149 : vector<8xf32> to vector<8x1xf32>
    %cst_44 = arith.constant 3.200000e+01 : f32
    %151 = vector.broadcast %cst_44 : f32 to vector<8x1xf32>
    %152 = arith.divf %150, %151 : vector<8x1xf32>
    %153 = vector.broadcast %152 : vector<8x1xf32> to vector<8x32xf32>
    %154 = arith.subf %148, %153 : vector<8x32xf32>
    %155 = arith.mulf %154, %154 : vector<8x32xf32>
    %cst_45 = arith.constant dense<0.000000e+00> : vector<8xf32>
    %156 = vector.multi_reduction <add>, %155, %cst_45 [1] : vector<8x32xf32> to vector<8xf32>
    %157 = vector.shape_cast %156 : vector<8xf32> to vector<8x1xf32>
    %cst_46 = arith.constant 3.200000e+01 : f32
    %158 = vector.broadcast %cst_46 : f32 to vector<8x1xf32>
    %159 = arith.divf %157, %158 : vector<8x1xf32>
    %160 = vector.broadcast %152 : vector<8x1xf32> to vector<8x32xf32>
    %161 = arith.subf %148, %160 : vector<8x32xf32>
    %cst_47 = arith.constant 9.99999996E-13 : f32
    %162 = vector.broadcast %cst_47 : f32 to vector<8x1xf32>
    %163 = arith.addf %159, %162 : vector<8x1xf32>
    %164 = math.rsqrt %163 : vector<8x1xf32>
    %165 = vector.broadcast %164 : vector<8x1xf32> to vector<8x32xf32>
    %166 = arith.mulf %161, %165 : vector<8x32xf32>
    %167 = vector.broadcast %38 : vector<1x32xf32> to vector<8x32xf32>
    %168 = arith.mulf %166, %167 : vector<8x32xf32>
    %169 = vector.broadcast %39 : vector<1x32xf32> to vector<8x32xf32>
    %170 = arith.addf %168, %169 : vector<8x32xf32>
    %c1_48 = arith.constant 1 : index
    %c0_49 = arith.constant 0 : index
    %c0_50 = arith.constant 0 : index
    %171 = vector.load %arg8[%c1_48, %c0_49, %c0_50] : memref<2x8x128xf32, #tpu.memory_space<vmem>>, vector<1x8x128xf32>
    %172 = vector.shape_cast %171 : vector<1x8x128xf32> to vector<8x128xf32>
    %173 = vector.extract_strided_slice %172 {offsets = [0, 0], sizes = [1, 96], strides = [1, 1]} : vector<8x128xf32> to vector<1x96xf32>
    %174 = vector.extract_strided_slice %172 {offsets = [1, 0], sizes = [1, 32], strides = [1, 1]} : vector<8x128xf32> to vector<1x32xf32>
    %175 = vector.extract_strided_slice %172 {offsets = [2, 0], sizes = [1, 32], strides = [1, 1]} : vector<8x128xf32> to vector<1x32xf32>
    %176 = vector.extract_strided_slice %172 {offsets = [3, 0], sizes = [1, 32], strides = [1, 1]} : vector<8x128xf32> to vector<1x32xf32>
    %177 = vector.extract_strided_slice %172 {offsets = [4, 0], sizes = [1, 64], strides = [1, 1]} : vector<8x128xf32> to vector<1x64xf32>
    %178 = vector.extract_strided_slice %172 {offsets = [5, 0], sizes = [1, 32], strides = [1, 1]} : vector<8x128xf32> to vector<1x32xf32>
    %179 = vector.extract_strided_slice %172 {offsets = [6, 0], sizes = [1, 32], strides = [1, 1]} : vector<8x128xf32> to vector<1x32xf32>
    %180 = vector.extract_strided_slice %172 {offsets = [7, 0], sizes = [1, 32], strides = [1, 1]} : vector<8x128xf32> to vector<1x32xf32>
    %c1_51 = arith.constant 1 : index
    %c0_52 = arith.constant 0 : index
    %c0_53 = arith.constant 0 : index
    %181 = vector.load %arg4[%c1_51, %c0_52, %c0_53] : memref<2x32x96xf32, #tpu.memory_space<vmem>>, vector<1x32x96xf32>
    %182 = vector.shape_cast %181 : vector<1x32x96xf32> to vector<32x96xf32>
    %cst_54 = arith.constant dense<0.000000e+00> : vector<8x96xf32>
    %183 = tpu.matmul %170, %182, %cst_54 {dimension_numbers = #tpu.dot_dimension_numbers<[1], [0], [0], [1], [0, 0, 1, 1], [], []>} : vector<8x32xf32>, vector<32x96xf32>, vector<8x96xf32> -> vector<8x96xf32>
    %184 = vector.broadcast %173 : vector<1x96xf32> to vector<8x96xf32>
    %185 = arith.addf %183, %184 : vector<8x96xf32>
    %186 = vector.extract_strided_slice %185 {offsets = [0, 0], sizes = [8, 32], strides = [1, 1]} : vector<8x96xf32> to vector<8x32xf32>
    %187 = vector.extract_strided_slice %186 {offsets = [0, 0], sizes = [8, 8], strides = [1, 1]} : vector<8x32xf32> to vector<8x8xf32>
    %188 = vector.extract_strided_slice %186 {offsets = [0, 8], sizes = [8, 8], strides = [1, 1]} : vector<8x32xf32> to vector<8x8xf32>
    %189 = vector.extract_strided_slice %186 {offsets = [0, 16], sizes = [8, 8], strides = [1, 1]} : vector<8x32xf32> to vector<8x8xf32>
    %190 = vector.extract_strided_slice %186 {offsets = [0, 24], sizes = [8, 8], strides = [1, 1]} : vector<8x32xf32> to vector<8x8xf32>
    %191 = vector.shape_cast %187 : vector<8x8xf32> to vector<1x8x8xf32>
    %192 = vector.shape_cast %188 : vector<8x8xf32> to vector<1x8x8xf32>
    %193 = vector.shape_cast %189 : vector<8x8xf32> to vector<1x8x8xf32>
    %194 = vector.shape_cast %190 : vector<8x8xf32> to vector<1x8x8xf32>
    %195 = tpu.concatenate %191, %192, %193, %194 in 0 : vector<1x8x8xf32>, vector<1x8x8xf32>, vector<1x8x8xf32>, vector<1x8x8xf32> -> vector<4x8x8xf32>
    %196 = vector.extract_strided_slice %185 {offsets = [0, 32], sizes = [8, 32], strides = [1, 1]} : vector<8x96xf32> to vector<8x32xf32>
    %197 = vector.extract_strided_slice %196 {offsets = [0, 0], sizes = [8, 8], strides = [1, 1]} : vector<8x32xf32> to vector<8x8xf32>
    %198 = vector.extract_strided_slice %196 {offsets = [0, 8], sizes = [8, 8], strides = [1, 1]} : vector<8x32xf32> to vector<8x8xf32>
    %199 = vector.extract_strided_slice %196 {offsets = [0, 16], sizes = [8, 8], strides = [1, 1]} : vector<8x32xf32> to vector<8x8xf32>
    %200 = vector.extract_strided_slice %196 {offsets = [0, 24], sizes = [8, 8], strides = [1, 1]} : vector<8x32xf32> to vector<8x8xf32>
    %201 = vector.shape_cast %197 : vector<8x8xf32> to vector<1x8x8xf32>
    %202 = vector.shape_cast %198 : vector<8x8xf32> to vector<1x8x8xf32>
    %203 = vector.shape_cast %199 : vector<8x8xf32> to vector<1x8x8xf32>
    %204 = vector.shape_cast %200 : vector<8x8xf32> to vector<1x8x8xf32>
    %205 = tpu.concatenate %201, %202, %203, %204 in 0 : vector<1x8x8xf32>, vector<1x8x8xf32>, vector<1x8x8xf32>, vector<1x8x8xf32> -> vector<4x8x8xf32>
    %206 = vector.extract_strided_slice %185 {offsets = [0, 64], sizes = [8, 32], strides = [1, 1]} : vector<8x96xf32> to vector<8x32xf32>
    %207 = vector.extract_strided_slice %206 {offsets = [0, 0], sizes = [8, 8], strides = [1, 1]} : vector<8x32xf32> to vector<8x8xf32>
    %208 = vector.extract_strided_slice %206 {offsets = [0, 8], sizes = [8, 8], strides = [1, 1]} : vector<8x32xf32> to vector<8x8xf32>
    %209 = vector.extract_strided_slice %206 {offsets = [0, 16], sizes = [8, 8], strides = [1, 1]} : vector<8x32xf32> to vector<8x8xf32>
    %210 = vector.extract_strided_slice %206 {offsets = [0, 24], sizes = [8, 8], strides = [1, 1]} : vector<8x32xf32> to vector<8x8xf32>
    %211 = vector.shape_cast %207 : vector<8x8xf32> to vector<1x8x8xf32>
    %212 = vector.shape_cast %208 : vector<8x8xf32> to vector<1x8x8xf32>
    %213 = vector.shape_cast %209 : vector<8x8xf32> to vector<1x8x8xf32>
    %214 = vector.shape_cast %210 : vector<8x8xf32> to vector<1x8x8xf32>
    %215 = tpu.concatenate %211, %212, %213, %214 in 0 : vector<1x8x8xf32>, vector<1x8x8xf32>, vector<1x8x8xf32>, vector<1x8x8xf32> -> vector<4x8x8xf32>
    "tpu.trace_start"() <{level = 10 : i32, message = "hqd,hkd->hqk"}> : () -> ()
    %cst_55 = arith.constant dense<0.000000e+00> : vector<4x8x8xf32>
    %216 = tpu.matmul %195, %205, %cst_55 {dimension_numbers = #tpu.dot_dimension_numbers<[2], [2], [1], [1], [0, 0, 0, 1, 1, 1], [0], [0]>} : vector<4x8x8xf32>, vector<4x8x8xf32>, vector<4x8x8xf32> -> vector<4x8x8xf32>
    "tpu.trace_stop"() : () -> ()
    %217 = arith.addf %216, %29 : vector<4x8x8xf32>
    %cst_56 = arith.constant dense<0xFF800000> : vector<4x8xf32>
    %218 = vector.multi_reduction <maximumf>, %217, %cst_56 [2] : vector<4x8x8xf32> to vector<4x8xf32>
    %219 = vector.shape_cast %218 : vector<4x8xf32> to vector<4x8x1xf32>
    %220 = vector.broadcast %219 : vector<4x8x1xf32> to vector<4x8x8xf32>
    %221 = arith.subf %217, %220 : vector<4x8x8xf32>
    %222 = math.exp %221 : vector<4x8x8xf32>
    %cst_57 = arith.constant dense<0.000000e+00> : vector<4x8xf32>
    %223 = vector.multi_reduction <add>, %222, %cst_57 [2] : vector<4x8x8xf32> to vector<4x8xf32>
    %224 = vector.shape_cast %223 : vector<4x8xf32> to vector<4x8x1xf32>
    %225 = tpu.reciprocal %224 {approx = true} : vector<4x8x1xf32> -> vector<4x8x1xf32>
    %226 = vector.broadcast %225 : vector<4x8x1xf32> to vector<4x8x8xf32>
    %227 = arith.mulf %222, %226 : vector<4x8x8xf32>
    "tpu.trace_start"() <{level = 10 : i32, message = "hqk,hkd->hqd"}> : () -> ()
    %cst_58 = arith.constant dense<0.000000e+00> : vector<4x8x8xf32>
    %228 = tpu.matmul %227, %215, %cst_58 {dimension_numbers = #tpu.dot_dimension_numbers<[2], [1], [1], [2], [0, 0, 0, 1, 1, 2], [0], [0]>} : vector<4x8x8xf32>, vector<4x8x8xf32>, vector<4x8x8xf32> -> vector<4x8x8xf32>
    "tpu.trace_stop"() : () -> ()
    %229 = vector.extract_strided_slice %228 {offsets = [0, 0, 0], sizes = [1, 8, 8], strides = [1, 1, 1]} : vector<4x8x8xf32> to vector<1x8x8xf32>
    %230 = vector.shape_cast %229 : vector<1x8x8xf32> to vector<8x8xf32>
    %231 = vector.extract_strided_slice %228 {offsets = [1, 0, 0], sizes = [1, 8, 8], strides = [1, 1, 1]} : vector<4x8x8xf32> to vector<1x8x8xf32>
    %232 = vector.shape_cast %231 : vector<1x8x8xf32> to vector<8x8xf32>
    %233 = vector.extract_strided_slice %228 {offsets = [2, 0, 0], sizes = [1, 8, 8], strides = [1, 1, 1]} : vector<4x8x8xf32> to vector<1x8x8xf32>
    %234 = vector.shape_cast %233 : vector<1x8x8xf32> to vector<8x8xf32>
    %235 = vector.extract_strided_slice %228 {offsets = [3, 0, 0], sizes = [1, 8, 8], strides = [1, 1, 1]} : vector<4x8x8xf32> to vector<1x8x8xf32>
    %236 = vector.shape_cast %235 : vector<1x8x8xf32> to vector<8x8xf32>
    %237 = tpu.concatenate %230, %232, %234, %236 in 1 : vector<8x8xf32>, vector<8x8xf32>, vector<8x8xf32>, vector<8x8xf32> -> vector<8x32xf32>
    %c1_59 = arith.constant 1 : index
    %c0_60 = arith.constant 0 : index
    %c0_61 = arith.constant 0 : index
    %238 = vector.load %arg5[%c1_59, %c0_60, %c0_61] : memref<2x32x32xf32, #tpu.memory_space<vmem>>, vector<1x32x32xf32>
    %239 = vector.shape_cast %238 : vector<1x32x32xf32> to vector<32x32xf32>
    %cst_62 = arith.constant dense<0.000000e+00> : vector<8x32xf32>
    %240 = tpu.matmul %237, %239, %cst_62 {dimension_numbers = #tpu.dot_dimension_numbers<[1], [0], [0], [1], [0, 0, 1, 1], [], []>} : vector<8x32xf32>, vector<32x32xf32>, vector<8x32xf32> -> vector<8x32xf32>
    %241 = vector.broadcast %174 : vector<1x32xf32> to vector<8x32xf32>
    %242 = arith.addf %240, %241 : vector<8x32xf32>
    %243 = arith.addf %170, %242 : vector<8x32xf32>
    %cst_63 = arith.constant dense<0.000000e+00> : vector<8xf32>
    %244 = vector.multi_reduction <add>, %243, %cst_63 [1] : vector<8x32xf32> to vector<8xf32>
    %245 = vector.shape_cast %244 : vector<8xf32> to vector<8x1xf32>
    %cst_64 = arith.constant 3.200000e+01 : f32
    %246 = vector.broadcast %cst_64 : f32 to vector<8x1xf32>
    %247 = arith.divf %245, %246 : vector<8x1xf32>
    %248 = vector.broadcast %247 : vector<8x1xf32> to vector<8x32xf32>
    %249 = arith.subf %243, %248 : vector<8x32xf32>
    %250 = arith.mulf %249, %249 : vector<8x32xf32>
    %cst_65 = arith.constant dense<0.000000e+00> : vector<8xf32>
    %251 = vector.multi_reduction <add>, %250, %cst_65 [1] : vector<8x32xf32> to vector<8xf32>
    %252 = vector.shape_cast %251 : vector<8xf32> to vector<8x1xf32>
    %cst_66 = arith.constant 3.200000e+01 : f32
    %253 = vector.broadcast %cst_66 : f32 to vector<8x1xf32>
    %254 = arith.divf %252, %253 : vector<8x1xf32>
    %255 = vector.broadcast %247 : vector<8x1xf32> to vector<8x32xf32>
    %256 = arith.subf %243, %255 : vector<8x32xf32>
    %cst_67 = arith.constant 9.99999996E-13 : f32
    %257 = vector.broadcast %cst_67 : f32 to vector<8x1xf32>
    %258 = arith.addf %254, %257 : vector<8x1xf32>
    %259 = math.rsqrt %258 : vector<8x1xf32>
    %260 = vector.broadcast %259 : vector<8x1xf32> to vector<8x32xf32>
    %261 = arith.mulf %256, %260 : vector<8x32xf32>
    %262 = vector.broadcast %175 : vector<1x32xf32> to vector<8x32xf32>
    %263 = arith.mulf %261, %262 : vector<8x32xf32>
    %264 = vector.broadcast %176 : vector<1x32xf32> to vector<8x32xf32>
    %265 = arith.addf %263, %264 : vector<8x32xf32>
    %c1_68 = arith.constant 1 : index
    %c0_69 = arith.constant 0 : index
    %c0_70 = arith.constant 0 : index
    %266 = vector.load %arg6[%c1_68, %c0_69, %c0_70] : memref<2x32x64xf32, #tpu.memory_space<vmem>>, vector<1x32x64xf32>
    %267 = vector.shape_cast %266 : vector<1x32x64xf32> to vector<32x64xf32>
    %cst_71 = arith.constant dense<0.000000e+00> : vector<8x64xf32>
    %268 = tpu.matmul %265, %267, %cst_71 {dimension_numbers = #tpu.dot_dimension_numbers<[1], [0], [0], [1], [0, 0, 1, 1], [], []>} : vector<8x32xf32>, vector<32x64xf32>, vector<8x64xf32> -> vector<8x64xf32>
    %269 = vector.broadcast %177 : vector<1x64xf32> to vector<8x64xf32>
    %270 = arith.addf %268, %269 : vector<8x64xf32>
    %271 = arith.mulf %270, %270 : vector<8x64xf32>
    %272 = arith.mulf %270, %271 : vector<8x64xf32>
    %cst_72 = arith.constant 4.471500e-02 : f32
    %273 = vector.broadcast %cst_72 : f32 to vector<8x64xf32>
    %274 = arith.mulf %273, %272 : vector<8x64xf32>
    %275 = arith.addf %270, %274 : vector<8x64xf32>
    %cst_73 = arith.constant 0.797884583 : f32
    %276 = vector.broadcast %cst_73 : f32 to vector<8x64xf32>
    %277 = arith.mulf %276, %275 : vector<8x64xf32>
    %278 = math.tanh %277 : vector<8x64xf32>
    %cst_74 = arith.constant 1.000000e+00 : f32
    %279 = vector.broadcast %cst_74 : f32 to vector<8x64xf32>
    %280 = arith.addf %279, %278 : vector<8x64xf32>
    %cst_75 = arith.constant 5.000000e-01 : f32
    %281 = vector.broadcast %cst_75 : f32 to vector<8x64xf32>
    %282 = arith.mulf %281, %280 : vector<8x64xf32>
    %283 = arith.mulf %270, %282 : vector<8x64xf32>
    %c1_76 = arith.constant 1 : index
    %c0_77 = arith.constant 0 : index
    %c0_78 = arith.constant 0 : index
    %284 = vector.load %arg7[%c1_76, %c0_77, %c0_78] : memref<2x64x32xf32, #tpu.memory_space<vmem>>, vector<1x64x32xf32>
    %285 = vector.shape_cast %284 : vector<1x64x32xf32> to vector<64x32xf32>
    %cst_79 = arith.constant dense<0.000000e+00> : vector<8x32xf32>
    %286 = tpu.matmul %283, %285, %cst_79 {dimension_numbers = #tpu.dot_dimension_numbers<[1], [0], [0], [1], [0, 0, 1, 1], [], []>} : vector<8x64xf32>, vector<64x32xf32>, vector<8x32xf32> -> vector<8x32xf32>
    %287 = vector.broadcast %178 : vector<1x32xf32> to vector<8x32xf32>
    %288 = arith.addf %286, %287 : vector<8x32xf32>
    %289 = arith.addf %265, %288 : vector<8x32xf32>
    %cst_80 = arith.constant dense<0.000000e+00> : vector<8xf32>
    %290 = vector.multi_reduction <add>, %289, %cst_80 [1] : vector<8x32xf32> to vector<8xf32>
    %291 = vector.shape_cast %290 : vector<8xf32> to vector<8x1xf32>
    %cst_81 = arith.constant 3.200000e+01 : f32
    %292 = vector.broadcast %cst_81 : f32 to vector<8x1xf32>
    %293 = arith.divf %291, %292 : vector<8x1xf32>
    %294 = vector.broadcast %293 : vector<8x1xf32> to vector<8x32xf32>
    %295 = arith.subf %289, %294 : vector<8x32xf32>
    %296 = arith.mulf %295, %295 : vector<8x32xf32>
    %cst_82 = arith.constant dense<0.000000e+00> : vector<8xf32>
    %297 = vector.multi_reduction <add>, %296, %cst_82 [1] : vector<8x32xf32> to vector<8xf32>
    %298 = vector.shape_cast %297 : vector<8xf32> to vector<8x1xf32>
    %cst_83 = arith.constant 3.200000e+01 : f32
    %299 = vector.broadcast %cst_83 : f32 to vector<8x1xf32>
    %300 = arith.divf %298, %299 : vector<8x1xf32>
    %301 = vector.broadcast %293 : vector<8x1xf32> to vector<8x32xf32>
    %302 = arith.subf %289, %301 : vector<8x32xf32>
    %cst_84 = arith.constant 9.99999996E-13 : f32
    %303 = vector.broadcast %cst_84 : f32 to vector<8x1xf32>
    %304 = arith.addf %300, %303 : vector<8x1xf32>
    %305 = math.rsqrt %304 : vector<8x1xf32>
    %306 = vector.broadcast %305 : vector<8x1xf32> to vector<8x32xf32>
    %307 = arith.mulf %302, %306 : vector<8x32xf32>
    %308 = vector.broadcast %179 : vector<1x32xf32> to vector<8x32xf32>
    %309 = arith.mulf %307, %308 : vector<8x32xf32>
    %310 = vector.broadcast %180 : vector<1x32xf32> to vector<8x32xf32>
    %311 = arith.addf %309, %310 : vector<8x32xf32>
    %312 = vector.extract_strided_slice %311 {offsets = [0, 0], sizes = [1, 32], strides = [1, 1]} : vector<8x32xf32> to vector<1x32xf32>
    %c0_85 = arith.constant 0 : index
    %c0_86 = arith.constant 0 : index
    %313 = vector.load %arg9[%c0_85, %c0_86] : memref<32x128xf32, #tpu.memory_space<vmem>>, vector<32x128xf32>
    %cst_87 = arith.constant dense<0.000000e+00> : vector<1x128xf32>
    %314 = tpu.matmul %312, %313, %cst_87 {dimension_numbers = #tpu.dot_dimension_numbers<[1], [0], [0], [1], [0, 0, 1, 1], [], []>} : vector<1x32xf32>, vector<32x128xf32>, vector<1x128xf32> -> vector<1x128xf32>
    %c0_88 = arith.constant 0 : index
    %c0_89 = arith.constant 0 : index
    %315 = vector.load %arg10[%c0_88, %c0_89] : memref<1x128xf32, #tpu.memory_space<vmem>>, vector<1x128xf32>
    %316 = arith.addf %314, %315 : vector<1x128xf32>
    %317 = vector.shape_cast %316 : vector<1x128xf32> to vector<1x1x128xf32>
    %c0_90 = arith.constant 0 : index
    %c0_91 = arith.constant 0 : index
    %c0_92 = arith.constant 0 : index
    %318 = vector.load %arg11[%c0_90, %c0_91, %c0_92] : memref<1x1x128xf32, #tpu.memory_space<vmem>>, vector<1x1x128xf32>
    tpu.vector_store %arg11[%c0_90, %c0_91, %c0_92], %317 {strides = array<i32>} : memref<1x1x128xf32, #tpu.memory_space<vmem>>, vector<1x1x128xf32>,
    return
  }
  func.func @transform_0(%arg0: i32) -> (i32, i32) {
    %c0_i32 = arith.constant 0 : i32
    %c0_i32_0 = arith.constant 0 : i32
    return %arg0, %c0_i32 : i32, i32
  }
  func.func @transform_1(%arg0: i32) -> (i32, i32, i32) {
    %c0_i32 = arith.constant 0 : i32
    %c0_i32_0 = arith.constant 0 : i32
    %c0_i32_1 = arith.constant 0 : i32
    return %arg0, %c0_i32, %c0_i32_0 : i32, i32, i32
  }
  func.func @transform_2(%arg0: i32) -> (i32, i32) {
    %c0_i32 = arith.constant 0 : i32
    %c0_i32_0 = arith.constant 0 : i32
    %c0_i32_1 = arith.constant 0 : i32
    return %c0_i32, %c0_i32_0 : i32, i32
  }
  func.func @transform_3(%arg0: i32) -> (i32, i32, i32) {
    %c0_i32 = arith.constant 0 : i32
    %c0_i32_0 = arith.constant 0 : i32
    %c0_i32_1 = arith.constant 0 : i32
    %c0_i32_2 = arith.constant 0 : i32
    return %c0_i32, %c0_i32_0, %c0_i32_1 : i32, i32, i32
  }
  func.func @transform_4(%arg0: i32) -> (i32, i32, i32) {
    %c0_i32 = arith.constant 0 : i32
    %c0_i32_0 = arith.constant 0 : i32
    %c0_i32_1 = arith.constant 0 : i32
    %c0_i32_2 = arith.constant 0 : i32
    return %c0_i32, %c0_i32_0, %c0_i32_1 : i32, i32, i32
  }
  func.func @transform_5(%arg0: i32) -> (i32, i32, i32) {
    %c0_i32 = arith.constant 0 : i32
    %c0_i32_0 = arith.constant 0 : i32
    %c0_i32_1 = arith.constant 0 : i32
    %c0_i32_2 = arith.constant 0 : i32
    return %c0_i32, %c0_i32_0, %c0_i32_1 : i32, i32, i32
  }
  func.func @transform_6(%arg0: i32) -> (i32, i32, i32) {
    %c0_i32 = arith.constant 0 : i32
    %c0_i32_0 = arith.constant 0 : i32
    %c0_i32_1 = arith.constant 0 : i32
    %c0_i32_2 = arith.constant 0 : i32
    return %c0_i32, %c0_i32_0, %c0_i32_1 : i32, i32, i32
  }
  func.func @transform_7(%arg0: i32) -> (i32, i32, i32) {
    %c0_i32 = arith.constant 0 : i32
    %c0_i32_0 = arith.constant 0 : i32
    %c0_i32_1 = arith.constant 0 : i32
    %c0_i32_2 = arith.constant 0 : i32
    return %c0_i32, %c0_i32_0, %c0_i32_1 : i32, i32, i32
  }
  func.func @transform_8(%arg0: i32) -> (i32, i32) {
    %c0_i32 = arith.constant 0 : i32
    %c0_i32_0 = arith.constant 0 : i32
    %c0_i32_1 = arith.constant 0 : i32
    return %c0_i32, %c0_i32_0 : i32, i32
  }
  func.func @transform_9(%arg0: i32) -> (i32, i32) {
    %c0_i32 = arith.constant 0 : i32
    %c0_i32_0 = arith.constant 0 : i32
    %c0_i32_1 = arith.constant 0 : i32
    return %c0_i32, %c0_i32_0 : i32, i32
  }
  func.func @transform_10(%arg0: i32) -> (i32, i32, i32) {
    %c0_i32 = arith.constant 0 : i32
    %c0_i32_0 = arith.constant 0 : i32
    %c0_i32_1 = arith.constant 0 : i32
    return %arg0, %c0_i32, %c0_i32_0 : i32, i32, i32
  }
}

</mosaic_0001>

<bundles_post_ra>
// kernel: distilbert_sentiment_forward.1
= control target key start
LH: loop header
LB: loop body
LE: loop exit
PB: predicated region body
PF: predicated region fallthrough
CT: control target
= control target key end

     0   :  { %s2141_s0 = inlined_call_operand.vmem [shape: f32[16,32], index: 0, kind: input, shape index: {}]   ;;  %s2142_s1 = inlined_call_operand.vmem [shape: f32[2,1,8], index: 1, kind: input, shape index: {}]   ;;  %s2143_s2 = inlined_call_operand.vmem [shape: f32[2,32], index: 2, kind: input, shape index: {}]   ;;  %s2144_s3 = inlined_call_operand.vmem [shape: f32[2,32,96], index: 3, kind: input, shape index: {}]   ;;  %s2145_s4 = inlined_call_operand.vmem [shape: f32[2,32,32], index: 4, kind: input, shape index: {}]   ;;  %s2146_s5 = inlined_call_operand.vmem [shape: f32[2,32,64], index: 5, kind: input, shape index: {}]   ;;  %s2147_s6 = inlined_call_operand.vmem [shape: f32[2,64,32], index: 6, kind: input, shape index: {}]   ;;  %s2148_s7 = inlined_call_operand.vmem [shape: f32[2,8,128], index: 7, kind: input, shape index: {}]   ;;  %s2149_s8 = inlined_call_operand.vmem [shape: f32[32,128], index: 8, kind: input, shape index: {}]   ;;  %s2150_s9 = inlined_call_operand.vmem [shape: f32[1,128], index: 9, kind: input, shape index: {}]   ;;  %s2151_s10 = inlined_call_operand.hbm [shape: f32[2,1,128], index: 10, kind: output, shape index: {}]  }
   0x1   :  { %2161 = sst [smem:[#allocation5_spill]] %s2141_s0 }
   0x2   :  { %15 = vsyncpa [#allocation3], 0 }
   0x3   :  { %17 = vsyncpa [#allocation3 + $0x1], 0  ;;  %s1730_s13 = smov 0   ;;  %s1732_s14 = smov 0  }
   0x4   :  { %s1734_s15 = smov 0   ;;  %s1736_s16 = smov 0  }
   0x5 LB: > { %s1751_s17 = sadd.s32 4294967295, %s1664_s16   ;;  %s1432_s18 = sadd.s32 4294967294, %s1664_s16   ;;  %s1664_s16 = sphi %s1736_s16, %s2175_s16   ;;  %s1660_s15 = sphi %s1734_s15, %s2174_s15   ;;  %s1656_s14 = sphi %s1732_s14, %s2173_s14   ;;  %s1652_s13 = sphi %s1730_s13, %s2172_s13  }
   0x6   : > { %s1755_s19 = sadd.s32 1, %s1664_s16   ;;  %s250_s20 = sadd.s32 1, %s1660_s15 }
   0x7   : > { %s247_s21 = ssub.s32 %s1664_s16, %s1755_s19  ;;  %p260_p0 = scmp.ne.s32.totalorder %s1660_s15, %s1656_s14 }
   0x8   : > { %p248_p1 = scmp.eq.s32.totalorder %s247_s21, 0  ;;  %p261_p2 = scmp.eq.s32.totalorder %s1751_s17, 1 }
   0x9   : > { %p266_p3 = scmp.ne.s32.totalorder %s1656_s14, %s1652_s13  ;;  %p267_p4 = scmp.eq.s32.totalorder %s1432_s18, 1 }
   0xa   : > { %s1766_s22 = scalar_select %p248_p1, %s1660_s15, %s250_s20  }
   0xb   : > { %p1768_p5 = por %p261_p2, %p260_p0  ;;  %p1772_p6 = por %p267_p4, %p266_p3 }
   0xc   : > { %p1435_p7 = scmp.ge.s32.totalorder %s1664_s16, 1  ;;  %p322_p8 = scmp.lt.s32.totalorder %s1664_s16, 3 }
   0xe   : > { %p323_p9 = pnand %p1435_p7, %p322_p8 }
   0xf   : > { %p361_p10 = scmp.lt.s32.totalorder (!%p323_p9), %s1751_s17, 1  ;;  %s2164_s0 = sld [smem:[#allocation5_spill]] (!%p323_p9) }
  0x10   : > { %326 = sbr.rel (%p323_p9) target bundleno = 4361 (0x1109), region = 60  ;;  %s2156_s28 = smov (!%p323_p9), 104  }
  0x11   : > { %s2160_s30 = smov (!%p323_p9), 120   ;;  %s2154_s11 = smov (!%p323_p9), 96  }
  0x12   : > { %s2152_s21 = smov (!%p323_p9), 64   ;;  %s2167_s18 = smov (!%p323_p9), 96  }
  0x13   : > { %s2169_s20 = smov (!%p323_p9), 16  }
  0x15   : > { %s1780_s25 = scalar_select %p361_p10, %s1751_s17, 1  ;;  %vm371_vm0 = vcmask 261120   ;;  %v1666_v2 = vmov 32.0   ;;  %v413_v14 = vld [vmem:[%s2144_s3 + $0x18] sm:$0xff]  ;;  %v412_v15 = vld [vmem:[%s2144_s3 + $0x10] sm:$0xff]  ;;  %v411_v16 = vld [vmem:[%s2144_s3 + $0x8] sm:$0xff] }
  0x16   : > { %1554 = vrcp.f32 %v1666_v2  ;;  %430 = vmatpush.msra.mxu0 %v413_v14  ;;  %v410_v17 = vld [vmem:[%s2144_s3] sm:$0xff]  ;;  %vm447_vm5 = vcmask 64512   ;;  %vm711_vm6 = vcmask 130048   ;;  %vm713_vm7 = vcmask 195584  }
  0x17   : > { %s1436_s26 = sshll.u32 %s1780_s25, 3  ;;  %s367_s29 = scalar_lea.vmem %s2142_s1, %s1780_s25  ;;  %v1552_v27 = vld [vmem:[%s2143_s2] ss:$0 sm:$0xff]  ;;  %v1553_v30 = vld [vmem:[%s2143_s2 + $0x1] ss:$0 sm:$0xff]  ;;  %vm816_vm11 = vcmask 523264  }
  0x18   : > { %s364_s12 = scalar_lea.vmem %s2164_s0, %s1436_s26  ;;  %431 = vmatpush.msra.mxu0 %v412_v15  ;;  %v1821_v33 = vld [vmem:[%s2148_s7] sm:$0xff]  ;;  %s2157_s25 = smov 8  }
  0x19   : > { %v368_v0 = vld [vmem:[%s364_s12] sm:$0xff]  ;;  %v414_v34 = vperm.slane %v1821_v33, 0  ;;  %s1670_s12 = smov 112   ;;  %s2159_s26 = smov 24  }
  0x1a   : > { %v372_v1 = vsel %vm371_vm0, %v368_v0, 0.0  ;;  %432 = vmatpush.msra.mxu0 %v411_v16  ;;  %v1855_v44 = vld [vmem:[%s367_s29] ss:$0 sm:$0xff]  ;;  %s2158_s29 = smov 16  }
  0x1b   : > { %373 = vadd.xlane.f32.xlu0 %v372_v1 }
  0x1c   : > { %v1555_v3 = vpop.eup %1554  ;;  %433 = vmatpush.msra.mxu0 %v410_v17 }
  0x1d   : > { %v376_v4 = vmul.f32 32.0, %v1555_v3  ;;  %vm380_vm1 = vweird.f32 %v1555_v3 }
  0x1f   : > { %v377_v5 = vsub.f32 1.0, %v376_v4 }
  0x21   : > { %v378_v6 = vmul.f32 %v1555_v3, %v377_v5 }
  0x23   : > { %v379_v7 = vadd.f32 %v1555_v3, %v378_v6 }
  0x25   : > { %v1791_v8 = vsel %vm380_vm1, %v1555_v3, %v379_v7 }
  0x8e   : > { %v374_v9 = vpop.xlane.xlu0 %373 }
  0x8f   : > { %v382_v10 = vmul.f32 %v1791_v8, %v374_v9 }
  0x91   : > { %v383_v11 = vsub.f32 %v368_v0, %v382_v10 }
  0x93   : > { %v384_v12 = vmul.f32 %v383_v11, %v383_v11 }
  0x95   : > { %v385_v13 = vsel %vm371_vm0, %v384_v12, 0.0 }
  0x96   : > { %386 = vadd.xlane.f32.xlu0 %v385_v13 }
 0x109   : > { %v387_v18 = vpop.xlane.xlu0 %386 }
 0x10a   : > { %v388_v19 = vmul.f32 %v387_v18, %v1791_v8 }
 0x10c   : > { %v389_v20 = vadd.f32 1e-12, %v388_v19 }
 0x10e   : > { %1556 = vrsqrt.f32 %v389_v20  ;;  %vm396_vm3 = vweird.f32 %v389_v20 }
 0x114   : > { %v1557_v21 = vpop.eup %1556 }
 0x115   : > { %v391_v22 = vmul.f32 %v1557_v21, %v389_v20  ;;  %vm397_vm2 = vweird.f32 %v1557_v21 }
 0x116   : > { %vm398_vm4 = vmor %vm396_vm3, %vm397_vm2 }
 0x117   : > { %v392_v23 = vmul.f32 %v1557_v21, %v391_v22 }
 0x119   : > { %v393_v24 = vmul.f32 0.5, %v392_v23 }
 0x11b   : > { %v394_v25 = vsub.f32 1.5, %v393_v24 }
 0x11d   : > { %v395_v26 = vmul.f32 %v1557_v21, %v394_v25 }
 0x11f   : > { %v399_v28 = vsel %vm398_vm4, %v1557_v21, %v395_v26 }
 0x120   : > { %v400_v29 = vmul.f32 %v399_v28, %v383_v11 }
 0x122   : > { %v402_v31 = vmul.f32 %v1552_v27, %v400_v29 }
 0x124   : > { %v1814_v32 = vadd.f32 %v1553_v30, %v402_v31 }
 0x126   : > { %1437 = vmatmul.msk.f32.vlgmr.msra.gmra.mxu0 %vm371_vm0, %v1814_v32 }
 0x1a3   : > { %v435_v35 = vpop.f32.mrf.mxu0 }
 0x1a4   : > { %v1824_v36 = vadd.f32 %v435_v35, %v414_v34 }
 0x1a6   : > { %443 = vrot.lane.b32.xlu2 %v1824_v36, %s2156_s28  ;;  %439 = vrot.lane.b32.xlu1 %v1824_v36, %s2160_s30  ;;  %s2165_s30 = smov 120   ;;  %s2170_s28 = smov 8  }
 0x1ae   : > { %445 = vrot.lane.b32.xlu2 %v1824_v36, %s2154_s11  ;;  %441 = vrot.lane.b32.xlu1 %v1824_v36, %s1670_s12 }
 0x200   : > { %v1834_v37 = vpop.permute.xlu2 %443 }
 0x201   : > { %524 = vrot.lane.b32.xlu2 %v1834_v37, %s2154_s11 }
 0x208   : > { %v446_v38 = vpop.permute.xlu2 %445 }
 0x209   : > { %1438 = vmatpush.xpose.msk.msra.mxu3 %vm447_vm5, %v446_v38  ;;  %v717_v38 = vld [vmem:[%s2145_s4 + $0x10] sm:$0xff] }
 0x20c   : > { %1439 = vmatmul.msk.f32.vlgmr.msra.gmra.mxu3 %vm447_vm5, %v1824_v36 }
 0x218   : > { %v440_v39 = vpop.permute.xlu1 %439 }
 0x219   : > { %472 = vrot.lane.b32.xlu0 %v440_v39, %s2154_s11 }
 0x220   : > { %v442_v40 = vpop.permute.xlu1 %441 }
 0x221   : > { %498 = vrot.lane.b32.xlu1 %v442_v40, %s2154_s11  ;;  %v1541_v15 = vpack.i.bf16 %v1834_v37, %v442_v40  ;;  %s2171_s11 = smov 24  }
 0x25b   : > { %v525_v41 = vpop.permute.xlu2 %524 }
 0x25c   : > { %1444 = vmatpush.xpose.msk.msra.mxu1 %vm447_vm5, %v525_v41 }
 0x25f   : > { %1445 = vmatmul.msk.f32.vlgmr.msra.gmra.mxu1 %vm447_vm5, %v1834_v37  ;;  %v718_v37 = vld [vmem:[%s2145_s4 + $0x18] sm:$0xff] }
 0x28b   : > { %v473_v42 = vpop.permute.xlu0 %472 }
 0x28c   : > { %1440 = vmatpush.xpose.msk.msra.mxu2 %vm447_vm5, %v473_v42 }
 0x28f   : > { %1441 = vmatmul.msk.f32.vlgmr.msra.gmra.mxu2 %vm447_vm5, %v440_v39  ;;  %v469_v48 = vpop.f32.mrf.mxu3 }
 0x290   : > { %v470_v55 = vadd.f32 %v1855_v44, %v469_v48 }
 0x292   : > { %v550_v56 = vsel %vm447_vm5, %v470_v55, -inf }
 0x293   : > { %v499_v43 = vpop.permute.xlu1 %498 }
 0x294   : > { %1442 = vmatpush.xpose.msk.msrb.mxu3 %vm447_vm5, %v499_v43 }
 0x297   : > { %1443 = vmatmul.msk.f32.vlgmr.msrb.gmra.mxu3 %vm447_vm5, %v442_v40  ;;  %v715_v40 = vld [vmem:[%s2145_s4] sm:$0xff] }
 0x2dc   : > { %v547_v45 = vpop.f32.mrf.mxu1 }
 0x2dd   : > { %v548_v46 = vadd.f32 %v1855_v44, %v547_v45 }
 0x2df   : > { %v559_v47 = vsel %vm447_vm5, %v548_v46, -inf }
 0x2e0   : > { %560 = vmax.xlane.f32.xlu0 %v559_v47 }
 0x2f4   : > { %620 = vrot.lane.b32.xlu0 %v440_v39, %s2152_s21  ;;  %v716_v39 = vld [vmem:[%s2145_s4 + $0x8] sm:$0xff] }
 0x312   : > { %v495_v49 = vpop.f32.mrf.mxu2 }
 0x313   : > { %v496_v50 = vadd.f32 %v1855_v44, %v495_v49  ;;  %v719_v49 = vperm.slane %v1821_v33, 1 }
 0x315   : > { %v553_v51 = vsel %vm447_vm5, %v496_v50, -inf }
 0x316   : > { %554 = vmax.xlane.f32.xlu1 %v553_v51 }
 0x31a   : > { %v521_v52 = vpop.f32.mrf.mxu3 }
 0x31b   : > { %v522_v53 = vadd.f32 %v1855_v44, %v521_v52 }
 0x31d   : > { %v556_v54 = vsel %vm447_vm5, %v522_v53, -inf }
 0x31e   : > { %557 = vmax.xlane.f32.xlu2 %v556_v54 }
 0x326   : > { %551 = vmax.xlane.f32.xlu2 %v550_v56 }
 0x353   : > { %v561_v57 = vpop.xlane.xlu0 %560 }
 0x354   : > { %v565_v58 = vsub.f32 %v548_v46, %v561_v57 }
 0x356   : > { %v572_v59 = vmul.f32 1.442695, %v565_v58 }
 0x358   : > { %1558 = vpow2.f32 %v572_v59  ;;  %v773_v59 = vld [vmem:[%s2146_s5 + $0x18] sm:$0xff] }
 0x35e   : > { %v1559_v60 = vpop.eup %1558 }
 0x35f   : > { %v583_v61 = vsel %vm447_vm5, %v1559_v60, 0.0 }
 0x360   : > { %584 = vadd.xlane.f32.xlu1 %v583_v61  ;;  %v770_v61 = vld [vmem:[%s2146_s5] sm:$0xff] }
 0x366   : > { %v621_v62 = vpop.permute.xlu0 %620 }
 0x367   : > { %641 = vmatpush.msra.mxu3 %v621_v62 }
 0x369   : > { %790 = vmatpush.msrb.mxu3 %v773_v59 }
 0x389   : > { %v555_v63 = vpop.xlane.xlu1 %554 }
 0x38a   : > { %v563_v0 = vsub.f32 %v496_v50, %v555_v63 }
 0x38c   : > { %v568_v1 = vmul.f32 1.442695, %v563_v0 }
 0x38e   : > { %1560 = vpow2.f32 %v568_v1 }
 0x391   : > { %v558_v2 = vpop.xlane.xlu2 %557 }
 0x392   : > { %v564_v3 = vsub.f32 %v522_v53, %v558_v2 }
 0x394   : > { %v1561_v4 = vpop.eup %1560  ;;  %v570_v5 = vmul.f32 1.442695, %v564_v3 }
 0x395   : > { %v577_v6 = vsel %vm447_vm5, %v1561_v4, 0.0 }
 0x396   : > { %1562 = vpow2.f32 %v570_v5  ;;  %578 = vadd.xlane.f32.xlu1 %v577_v6 }
 0x399   : > { %v552_v7 = vpop.xlane.xlu2 %551 }
 0x39a   : > { %v562_v9 = vsub.f32 %v470_v55, %v552_v7  ;;  %v766_v7 = vperm.slane %v1821_v33, 2 }
 0x39c   : > { %v1563_v10 = vpop.eup %1562  ;;  %v566_v11 = vmul.f32 1.442695, %v562_v9 }
 0x39d   : > { %v580_v12 = vsel %vm447_vm5, %v1563_v10, 0.0 }
 0x39e   : > { %1564 = vpow2.f32 %v566_v11  ;;  %581 = vadd.xlane.f32.xlu2 %v580_v12  ;;  %v768_v11 = vperm.slane %v1821_v33, 3 }
 0x3a4   : > { %v1565_v13 = vpop.eup %1564 }
 0x3a5   : > { %v574_v14 = vsel %vm447_vm5, %v1565_v13, 0.0 }
 0x3a6   : > { %575 = vadd.xlane.f32.xlu1 %v574_v14  ;;  %v814_v14 = vld [vmem:[%s2147_s6 + $0x38] sm:$0xff] }
 0x3b6   : > { %1542 = vrot.lane.b32.xlu2 %v1541_v15, %s2152_s21  ;;  %v813_v15 = vld [vmem:[%s2147_s6 + $0x30] sm:$0xff] }
 0x3bf   : > { %594 = vrot.lane.b32.xlu1 %v1824_v36, %s2152_s21 }
 0x3d3   : > { %v585_v16 = vpop.xlane.xlu1 %584 }
 0x409   : > { %v579_v17 = vpop.xlane.xlu1 %578 }
 0x40a   : > { %1566 = vrcp.f32 %v579_v17  ;;  %v811_v17 = vld [vmem:[%s2147_s6 + $0x20] sm:$0xff] }
 0x40b   : > { %1568 = vrcp.f32 %v585_v16  ;;  %v812_v16 = vld [vmem:[%s2147_s6 + $0x28] sm:$0xff] }
 0x410   : > { %v1567_v18 = vpop.eup %1566 }
 0x411   : > { %v591_v19 = vmul.f32 %v1567_v18, %v1561_v4  ;;  %v582_v20 = vpop.xlane.xlu2 %581  ;;  %v1569_v21 = vpop.eup %1568  ;;  %v810_v18 = vld [vmem:[%s2147_s6 + $0x18] sm:$0xff] }
 0x412   : > { %1570 = vrcp.f32 %v582_v20  ;;  %v593_v27 = vmul.f32 %v1569_v21, %v1559_v60  ;;  %v771_v60 = vld [vmem:[%s2146_s5 + $0x8] sm:$0xff]  ;;  %v807_v21 = vld [vmem:[%s2147_s6] sm:$0xff] }
 0x413   : > { %1447 = vmatmul.msk.f32.vlgmr.msra.gmra.mxu3 %vm447_vm5, %v591_v19  ;;  %v809_v19 = vld [vmem:[%s2147_s6 + $0x10] sm:$0xff]  ;;  %v808_v20 = vld [vmem:[%s2147_s6 + $0x8] sm:$0xff] }
 0x418   : > { %v1571_v22 = vpop.eup %1570 }
 0x419   : > { %v1543_v23 = vpop.permute.xlu2 %1542  ;;  %v592_v26 = vmul.f32 %v1571_v22, %v1563_v10  ;;  %v576_v28 = vpop.xlane.xlu1 %575  ;;  %v774_v22 = vperm.slane %v1821_v33, 4 }
 0x41a   : > { %v1544_v24 = vunpack.i.l.bf16 %v1543_v23  ;;  %v1545_v25 = vunpack.i.h.bf16 %v1543_v23  ;;  %1572 = vrcp.f32 %v576_v28 }
 0x41c   : > { %667 = vmatpush.msrb.mxu0 %v1544_v24  ;;  %693 = vmatpush.msrb.mxu1 %v1545_v25 }
 0x41d   : > { %1448 = vmatmul.msk.f32.vlgmr.msrb.gmra.mxu0 %vm447_vm5, %v592_v26  ;;  %1449 = vmatmul.msk.f32.vlgmr.msrb.gmra.mxu1 %vm447_vm5, %v593_v27 }
 0x41e   : > { %828 = vmatpush.msra.mxu0 %v814_v14 }
 0x420   : > { %v1573_v29 = vpop.eup %1572  ;;  %829 = vmatpush.msra.mxu0 %v813_v15 }
 0x421   : > { %v590_v31 = vmul.f32 %v1573_v29, %v1565_v13 }
 0x422   : > { %830 = vmatpush.msra.mxu0 %v812_v16 }
 0x424   : > { %831 = vmatpush.msra.mxu0 %v811_v17 }
 0x426   : > { %832 = vmatpush.msra.mxu0 %v810_v18 }
 0x428   : > { %833 = vmatpush.msra.mxu0 %v809_v19 }
 0x42a   : > { %834 = vmatpush.msra.mxu0 %v808_v20 }
 0x42c   : > { %835 = vmatpush.msra.mxu0 %v807_v21 }
 0x431   : > { %v595_v30 = vpop.permute.xlu1 %594 }
 0x432   : > { %615 = vmatpush.msrb.mxu2 %v595_v30 }
 0x433   : > { %1446 = vmatmul.msk.f32.vlgmr.msrb.gmra.mxu2 %vm447_vm5, %v590_v31 }
 0x434   : > { %735 = vmatpush.msra.mxu2 %v718_v37 }
 0x436   : > { %736 = vmatpush.msra.mxu2 %v717_v38 }
 0x438   : > { %737 = vmatpush.msra.mxu2 %v716_v39 }
 0x43a   : > { %738 = vmatpush.msra.mxu2 %v715_v40 }
 0x496   : > { %v643_v34 = vpop.f32.mrf.mxu3 }
 0x497   : > { %699 = vrot.lane.b32.xlu0 %v643_v34, %s2157_s25 }
 0x49a   : > { %v669_v35 = vpop.f32.mrf.mxu0  ;;  %v695_v36 = vpop.f32.mrf.mxu1 }
 0x49b   : > { %703 = vrot.lane.b32.xlu2 %v669_v35, %s2158_s29 }
 0x49f   : > { %707 = vrot.lane.b32.xlu0 %v695_v36, %s2159_s26  ;;  %v815_v36 = vperm.slane %v1821_v33, 5  ;;  %s2166_s26 = smov 104  }
 0x4b6   : > { %v617_v42 = vpop.f32.mrf.mxu2 }
 0x4f5   : > { %v704_v45 = vpop.permute.xlu2 %703 }
 0x509   : > { %v700_v41 = vpop.permute.xlu0 %699 }
 0x50a   : > { %v710_v43 = vsel %vm447_vm5, %v617_v42, %v700_v41 }
 0x50b   : > { %v712_v47 = vsel %vm711_vm6, %v710_v43, %v704_v45 }
 0x511   : > { %v708_v46 = vpop.permute.xlu0 %707 }
 0x512   : > { %v714_v48 = vsel %vm713_vm7, %v712_v47, %v708_v46  ;;  %v1457_v47 = vld [vmem:[%s2144_s3 + $0x38] sm:$0xff] }
 0x513   : > { %1450 = vmatmul.msk.f32.vlgmr.msra.gmra.mxu2 %vm371_vm0, %v714_v48  ;;  %890 = vmatpush.msra.mxu1 %v1457_v47  ;;  %v1456_v48 = vld [vmem:[%s2144_s3 + $0x30] sm:$0xff] }
 0x515   : > { %891 = vmatpush.msra.mxu1 %v1456_v48 }
 0x596   : > { %v740_v50 = vpop.f32.mrf.mxu2 }
 0x597   : > { %v741_v51 = vadd.f32 %v740_v50, %v719_v49  ;;  %v1455_v49 = vld [vmem:[%s2144_s3 + $0x28] sm:$0xff]  ;;  %v1454_v50 = vld [vmem:[%s2144_s3 + $0x20] sm:$0xff] }
 0x598   : > { %892 = vmatpush.msra.mxu1 %v1455_v49 }
 0x599   : > { %v743_v52 = vadd.f32 %v741_v51, %v1814_v32  ;;  %v772_v32 = vld [vmem:[%s2146_s5 + $0x10] sm:$0xff] }
 0x59a   : > { %791 = vmatpush.msrb.mxu3 %v772_v32  ;;  %893 = vmatpush.msra.mxu1 %v1454_v50  ;;  %v863_v32 = vperm.slane %v1821_v33, 6 }
 0x59b   : > { %v744_v53 = vsel %vm371_vm0, %v743_v52, 0.0 }
 0x59c   : > { %745 = vadd.xlane.f32.xlu2 %v744_v53  ;;  %792 = vmatpush.msrb.mxu3 %v771_v60 }
 0x59e   : > { %793 = vmatpush.msrb.mxu3 %v770_v61 }
 0x60f   : > { %v746_v54 = vpop.xlane.xlu2 %745 }
 0x610   : > { %v747_v55 = vmul.f32 %v746_v54, %v1791_v8 }
 0x612   : > { %v748_v56 = vsub.f32 %v743_v52, %v747_v55 }
 0x614   : > { %v749_v57 = vmul.f32 %v748_v56, %v748_v56 }
 0x616   : > { %v750_v58 = vsel %vm371_vm0, %v749_v57, 0.0 }
 0x617   : > { %751 = vadd.xlane.f32.xlu0 %v750_v58 }
 0x68a   : > { %v752_v62 = vpop.xlane.xlu0 %751 }
 0x68b   : > { %v753_v63 = vmul.f32 %v752_v62, %v1791_v8  ;;  %v865_v62 = vperm.slane %v1821_v33, 7 }
 0x68d   : > { %v754_v0 = vadd.f32 1e-12, %v753_v63 }
 0x68f   : > { %1574 = vrsqrt.f32 %v754_v0  ;;  %vm761_vm9 = vweird.f32 %v754_v0 }
 0x695   : > { %v1575_v1 = vpop.eup %1574 }
 0x696   : > { %v756_v2 = vmul.f32 %v1575_v1, %v754_v0  ;;  %vm762_vm8 = vweird.f32 %v1575_v1 }
 0x697   : > { %vm763_vm10 = vmor %vm761_vm9, %vm762_vm8 }
 0x698   : > { %v757_v3 = vmul.f32 %v1575_v1, %v756_v2 }
 0x69a   : > { %v758_v4 = vmul.f32 0.5, %v757_v3 }
 0x69c   : > { %v759_v5 = vsub.f32 1.5, %v758_v4 }
 0x69e   : > { %v760_v6 = vmul.f32 %v1575_v1, %v759_v5 }
 0x6a0   : > { %v764_v9 = vsel %vm763_vm10, %v1575_v1, %v760_v6  ;;  %v1970_v1 = vld [vmem:[%s2148_s7 + $0x8] sm:$0xff] }
 0x6a1   : > { %v765_v10 = vmul.f32 %v764_v9, %v748_v56  ;;  %v874_v2 = vperm.slane %v1970_v1, 0 }
 0x6a3   : > { %v767_v12 = vmul.f32 %v766_v7, %v765_v10 }
 0x6a5   : > { %v769_v13 = vadd.f32 %v768_v11, %v767_v12 }
 0x6a7   : > { %1451 = vmatmul.msk.f32.vlgmr.msrb.gmra.mxu3 %vm371_vm0, %v769_v13 }
 0x72a   : > { %v795_v23 = vpop.f32.mrf.mxu3 }
 0x72b   : > { %v796_v24 = vadd.f32 %v795_v23, %v774_v22 }
 0x72d   : > { %v798_v25 = vmul.f32 %v796_v24, %v796_v24 }
 0x72f   : > { %v799_v26 = vmul.f32 %v798_v25, %v796_v24 }
 0x731   : > { %v800_v27 = vmul.f32 0.044715, %v799_v26 }
 0x733   : > { %v801_v28 = vadd.f32 %v800_v27, %v796_v24 }
 0x735   : > { %v802_v29 = vmul.f32 0.7978846, %v801_v28 }
 0x737   : > { %1576 = vtanh.f32 %v802_v29 }
 0x73d   : > { %v1577_v30 = vpop.eup %1576 }
 0x73e   : > { %v804_v31 = vadd.f32 1.0, %v1577_v30 }
 0x740   : > { %v805_v34 = vmul.f32 0.5, %v804_v31 }
 0x742   : > { %v806_v35 = vmul.f32 %v805_v34, %v796_v24 }
 0x744   : > { %1452 = vmatmul.msk.f32.vlgmr.msra.gmra.mxu0 %vm816_vm11, %v806_v35 }
 0x7c1   : > { %v837_v37 = vpop.f32.mrf.mxu0 }
 0x7c2   : > { %v838_v38 = vadd.f32 %v837_v37, %v815_v36 }
 0x7c4   : > { %v840_v39 = vadd.f32 %v838_v38, %v769_v13 }
 0x7c6   : > { %v841_v40 = vsel %vm371_vm0, %v840_v39, 0.0 }
 0x7c7   : > { %842 = vadd.xlane.f32.xlu1 %v841_v40 }
 0x83a   : > { %v843_v41 = vpop.xlane.xlu1 %842 }
 0x83b   : > { %v844_v42 = vmul.f32 %v843_v41, %v1791_v8 }
 0x83d   : > { %v845_v43 = vsub.f32 %v840_v39, %v844_v42 }
 0x83f   : > { %v846_v45 = vmul.f32 %v845_v43, %v845_v43 }
 0x841   : > { %v847_v46 = vsel %vm371_vm0, %v846_v45, 0.0 }
 0x842   : > { %848 = vadd.xlane.f32.xlu2 %v847_v46 }
 0x8b5   : > { %v849_v51 = vpop.xlane.xlu2 %848 }
 0x8b6   : > { %v850_v52 = vmul.f32 %v849_v51, %v1791_v8 }
 0x8b8   : > { %v851_v53 = vadd.f32 1e-12, %v850_v52 }
 0x8ba   : > { %1578 = vrsqrt.f32 %v851_v53  ;;  %vm858_vm13 = vweird.f32 %v851_v53 }
 0x8c0   : > { %v1579_v54 = vpop.eup %1578 }
 0x8c1   : > { %v853_v55 = vmul.f32 %v1579_v54, %v851_v53  ;;  %vm859_vm12 = vweird.f32 %v1579_v54 }
 0x8c2   : > { %vm860_vm14 = vmor %vm858_vm13, %vm859_vm12 }
 0x8c3   : > { %v854_v56 = vmul.f32 %v1579_v54, %v853_v55 }
 0x8c5   : > { %v855_v57 = vmul.f32 0.5, %v854_v56 }
 0x8c7   : > { %v856_v58 = vsub.f32 1.5, %v855_v57 }
 0x8c9   : > { %v857_v59 = vmul.f32 %v1579_v54, %v856_v58 }
 0x8cb   : > { %v861_v60 = vsel %vm860_vm14, %v1579_v54, %v857_v59 }
 0x8cc   : > { %v862_v61 = vmul.f32 %v861_v60, %v845_v43 }
 0x8ce   : > { %v864_v63 = vmul.f32 %v863_v32, %v862_v61 }
 0x8d0   : > { %v1963_v0 = vadd.f32 %v865_v62, %v864_v63 }
 0x8d2   : > { %1458 = vmatmul.msk.f32.vlgmr.msra.gmra.mxu1 %vm371_vm0, %v1963_v0 }
 0x94f   : > { %v895_v3 = vpop.f32.mrf.mxu1 }
 0x950   : > { %v1973_v4 = vadd.f32 %v895_v3, %v874_v2 }
 0x952   : > { %901 = vrot.lane.b32.xlu2 %v1973_v4, %s1670_s12  ;;  %899 = vrot.lane.b32.xlu1 %v1973_v4, %s2165_s30  ;;  %s2168_s12 = smov 64  }
 0x953   : > { %903 = vrot.lane.b32.xlu0 %v1973_v4, %s2166_s26 }
 0x95b   : > { %905 = vrot.lane.b32.xlu0 %v1973_v4, %s2167_s18 }
 0x9ac   : > { %v1983_v33 = vpop.permute.xlu2 %901 }
 0x9ad   : > { %957 = vrot.lane.b32.xlu2 %v1983_v33, %s2167_s18 }
 0x9c4   : > { %v900_v5 = vpop.permute.xlu1 %899 }
 0x9c5   : > { %v904_v6 = vpop.permute.xlu0 %903  ;;  %931 = vrot.lane.b32.xlu0 %v900_v5, %s2167_s18 }
 0x9c6   : > { %983 = vrot.lane.b32.xlu1 %v904_v6, %s2167_s18  ;;  %v1546_v46 = vpack.i.bf16 %v900_v5, %v904_v6 }
 0x9cd   : > { %v906_v7 = vpop.permute.xlu0 %905 }
 0x9ce   : > { %1459 = vmatpush.xpose.msk.msrb.mxu2 %vm447_vm5, %v906_v7 }
 0x9d1   : > { %1460 = vmatmul.msk.f32.vlgmr.msrb.gmra.mxu2 %vm447_vm5, %v1973_v4 }
 0xa07   : > { %v958_v9 = vpop.permute.xlu2 %957 }
 0xa08   : > { %1463 = vmatpush.xpose.msk.msrb.mxu1 %vm447_vm5, %v958_v9 }
 0xa0b   : > { %1464 = vmatmul.msk.f32.vlgmr.msrb.gmra.mxu1 %vm447_vm5, %v1983_v33 }
 0xa37   : > { %v932_v10 = vpop.permute.xlu0 %931 }
 0xa38   : > { %v984_v11 = vpop.permute.xlu1 %983  ;;  %1461 = vmatpush.xpose.msk.msra.mxu3 %vm447_vm5, %v932_v10 }
 0xa39   : > { %1465 = vmatpush.xpose.msk.msra.mxu2 %vm447_vm5, %v984_v11 }
 0xa3b   : > { %1462 = vmatmul.msk.f32.vlgmr.msra.gmra.mxu3 %vm447_vm5, %v900_v5  ;;  %v1472_v5 = vld [vmem:[%s2145_s4 + $0x28] sm:$0xff] }
 0xa3c   : > { %1466 = vmatmul.msk.f32.vlgmr.msra.gmra.mxu2 %vm447_vm5, %v904_v6  ;;  %v1471_v6 = vld [vmem:[%s2145_s4 + $0x20] sm:$0xff] }
 0xa54   : > { %v928_v15 = vpop.f32.mrf.mxu2 }
 0xa55   : > { %v929_v22 = vadd.f32 %v1855_v44, %v928_v15  ;;  %v1177_v15 = vperm.slane %v1970_v1, 1 }
 0xa57   : > { %v1009_v23 = vsel %vm447_vm5, %v929_v22, -inf }
 0xa88   : > { %v980_v12 = vpop.f32.mrf.mxu1 }
 0xa89   : > { %v981_v13 = vadd.f32 %v1855_v44, %v980_v12 }
 0xa8b   : > { %v1015_v14 = vsel %vm447_vm5, %v981_v13, -inf }
 0xa8c   : > { %1016 = vmax.xlane.f32.xlu2 %v1015_v14 }
 0xabe   : > { %v954_v16 = vpop.f32.mrf.mxu3 }
 0xabf   : > { %v955_v17 = vadd.f32 %v1855_v44, %v954_v16  ;;  %v1006_v18 = vpop.f32.mrf.mxu2 }
 0xac0   : > { %v1007_v19 = vadd.f32 %v1855_v44, %v1006_v18 }
 0xac1   : > { %v1012_v20 = vsel %vm447_vm5, %v955_v17, -inf }
 0xac2   : > { %v1018_v21 = vsel %vm447_vm5, %v1007_v19, -inf  ;;  %1013 = vmax.xlane.f32.xlu0 %v1012_v20 }
 0xac3   : > { %1019 = vmax.xlane.f32.xlu1 %v1018_v21 }
 0xacb   : > { %1010 = vmax.xlane.f32.xlu1 %v1009_v23 }
 0xaff   : > { %v1017_v24 = vpop.xlane.xlu2 %1016 }
 0xb00   : > { %v1023_v25 = vsub.f32 %v981_v13, %v1017_v24 }
 0xb02   : > { %v1029_v26 = vmul.f32 1.442695, %v1023_v25  ;;  %v1479_v25 = vld [vmem:[%s2146_s5 + $0x38] sm:$0xff] }
 0xb04   : > { %1580 = vpow2.f32 %v1029_v26  ;;  %v1477_v26 = vld [vmem:[%s2146_s5 + $0x28] sm:$0xff] }
 0xb0a   : > { %v1581_v27 = vpop.eup %1580 }
 0xb0b   : > { %v1039_v28 = vsel %vm447_vm5, %v1581_v27, 0.0 }
 0xb0c   : > { %1040 = vadd.xlane.f32.xlu1 %v1039_v28 }
 0xb35   : > { %v1014_v29 = vpop.xlane.xlu0 %1013 }
 0xb36   : > { %v1020_v30 = vpop.xlane.xlu1 %1019  ;;  %v1022_v31 = vsub.f32 %v955_v17, %v1014_v29 }
 0xb37   : > { %v1024_v34 = vsub.f32 %v1007_v19, %v1020_v30 }
 0xb38   : > { %v1027_v35 = vmul.f32 1.442695, %v1022_v31 }
 0xb39   : > { %v1031_v36 = vmul.f32 1.442695, %v1024_v34 }
 0xb3a   : > { %1582 = vpow2.f32 %v1027_v35 }
 0xb3b   : > { %1584 = vpow2.f32 %v1031_v36 }
 0xb3e   : > { %v1011_v44 = vpop.xlane.xlu1 %1010 }
 0xb3f   : > { %v1021_v37 = vsub.f32 %v929_v22, %v1011_v44 }
 0xb40   : > { %v1583_v38 = vpop.eup %1582 }
 0xb41   : > { %v1585_v39 = vpop.eup %1584  ;;  %v1025_v40 = vmul.f32 1.442695, %v1021_v37  ;;  %v1036_v41 = vsel %vm447_vm5, %v1583_v38, 0.0 }
 0xb42   : > { %v1042_v42 = vsel %vm447_vm5, %v1585_v39, 0.0  ;;  %1037 = vadd.xlane.f32.xlu2 %v1036_v41  ;;  %v1226_v41 = vperm.slane %v1970_v1, 3 }
 0xb43   : > { %1586 = vpow2.f32 %v1025_v40  ;;  %1043 = vadd.xlane.f32.xlu0 %v1042_v42 }
 0xb49   : > { %v1587_v43 = vpop.eup %1586 }
 0xb4a   : > { %v1033_v45 = vsel %vm447_vm5, %v1587_v43, 0.0 }
 0xb4b   : > { %1034 = vadd.xlane.f32.xlu1 %v1033_v45  ;;  %v1488_v45 = vld [vmem:[%s2147_s6 + $0x78] sm:$0xff] }
 0xb57   : > { %1547 = vrot.lane.b32.xlu0 %v1546_v46, %s2168_s12  ;;  %v1487_v46 = vld [vmem:[%s2147_s6 + $0x70] sm:$0xff] }
 0xb5a   : > { %1105 = vrot.lane.b32.xlu2 %v1983_v33, %s2168_s12  ;;  %v1473_v33 = vld [vmem:[%s2145_s4 + $0x30] sm:$0xff] }
 0xb64   : > { %1053 = vrot.lane.b32.xlu1 %v1973_v4, %s2168_s12  ;;  %v1474_v4 = vld [vmem:[%s2145_s4 + $0x38] sm:$0xff]  ;;  %s359_s12 = sand.u32 1, %s1656_s14  }
 0xb65   : > { %s360_s29 = scalar_lea.vmem [#allocation2], %s359_s12  ;;  %s1356_s26 = scalar_lea.sflag [#allocation3], %s359_s12 }
 0xb66   : > { %s1366_s27 = sshll.u32 %s360_s29, 4  ;;  %s1367_s27 = int_to_ptr.vmem [resolvable:$true] %s1366_s27 }
 0xb7f   : > { %v1041_v47 = vpop.xlane.xlu1 %1040 }
 0xb80   : > { %1588 = vrcp.f32 %v1041_v47  ;;  %v1486_v47 = vld [vmem:[%s2147_s6 + $0x68] sm:$0xff] }
 0xb86   : > { %v1589_v49 = vpop.eup %1588 }
 0xb87   : > { %v1051_v50 = vmul.f32 %v1589_v49, %v1581_v27  ;;  %v1476_v27 = vld [vmem:[%s2146_s5 + $0x20] sm:$0xff]  ;;  %v1484_v49 = vld [vmem:[%s2147_s6 + $0x58] sm:$0xff] }
 0xbb5   : > { %v1038_v48 = vpop.xlane.xlu2 %1037 }
 0xbb6   : > { %v1044_v52 = vpop.xlane.xlu0 %1043  ;;  %1590 = vrcp.f32 %v1038_v48  ;;  %v1485_v48 = vld [vmem:[%s2147_s6 + $0x60] sm:$0xff] }
 0xbb7   : > { %1592 = vrcp.f32 %v1044_v52  ;;  %v1481_v52 = vld [vmem:[%s2147_s6 + $0x40] sm:$0xff] }
 0xbbc   : > { %v1591_v53 = vpop.eup %1590 }
 0xbbd   : > { %v1106_v51 = vpop.permute.xlu2 %1105  ;;  %v1593_v54 = vpop.eup %1592  ;;  %v1050_v59 = vmul.f32 %v1591_v53, %v1583_v38  ;;  %v1224_v38 = vperm.slane %v1970_v1, 2  ;;  %v1233_v53 = vperm.slane %v1970_v1, 4 }
 0xbbe   : > { %1126 = vmatpush.msra.mxu1 %v1106_v51  ;;  %v1035_v56 = vpop.xlane.xlu1 %1034  ;;  %v1052_v32 = vmul.f32 %v1593_v54, %v1585_v39  ;;  %v1482_v51 = vld [vmem:[%s2147_s6 + $0x48] sm:$0xff] }
 0xbbf   : > { %1469 = vmatmul.msk.f32.vlgmr.msra.gmra.mxu1 %vm447_vm5, %v1051_v50  ;;  %1594 = vrcp.f32 %v1035_v56  ;;  %v1483_v50 = vld [vmem:[%s2147_s6 + $0x50] sm:$0xff] }
 0xbc0   : > { %1287 = vmatpush.msrb.mxu1 %v1488_v45 }
 0xbc2   : > { %1288 = vmatpush.msrb.mxu1 %v1487_v46 }
 0xbc4   : > { %1289 = vmatpush.msrb.mxu1 %v1486_v47 }
 0xbc5   : > { %v1595_v60 = vpop.eup %1594 }
 0xbc6   : > { %v1049_v61 = vmul.f32 %v1595_v60, %v1587_v43  ;;  %1290 = vmatpush.msrb.mxu1 %v1485_v48 }
 0xbc8   : > { %1291 = vmatpush.msrb.mxu1 %v1484_v49 }
 0xbc9   : > { %v1548_v55 = vpop.permute.xlu0 %1547 }
 0xbca   : > { %v1550_v57 = vunpack.i.h.bf16 %v1548_v55  ;;  %v1549_v58 = vunpack.i.l.bf16 %v1548_v55  ;;  %1292 = vmatpush.msrb.mxu1 %v1483_v50 }
 0xbcc   : > { %1100 = vmatpush.msrb.mxu0 %v1550_v57  ;;  %1152 = vmatpush.msrb.mxu2 %v1549_v58 }
 0xbcd   : > { %1468 = vmatmul.msk.f32.vlgmr.msrb.gmra.mxu0 %vm447_vm5, %v1050_v59  ;;  %1470 = vmatmul.msk.f32.vlgmr.msrb.gmra.mxu2 %vm447_vm5, %v1052_v32 }
 0xbce   : > { %1249 = vmatpush.msra.mxu0 %v1479_v25  ;;  %1293 = vmatpush.msrb.mxu1 %v1482_v51  ;;  %v1322_v25 = vperm.slane %v1970_v1, 6 }
 0xbd0   : > { %1294 = vmatpush.msrb.mxu1 %v1481_v52 }
 0xbd6   : > { %v1054_v62 = vpop.permute.xlu1 %1053 }
 0xbd7   : > { %1074 = vmatpush.msrb.mxu3 %v1054_v62 }
 0xbd8   : > { %1467 = vmatmul.msk.f32.vlgmr.msrb.gmra.mxu3 %vm447_vm5, %v1049_v61 }
 0xbd9   : > { %1193 = vmatpush.msra.mxu3 %v1474_v4 }
 0xbdb   : > { %1194 = vmatpush.msra.mxu3 %v1473_v33 }
 0xbdd   : > { %1195 = vmatpush.msra.mxu3 %v1472_v5 }
 0xbdf   : > { %1196 = vmatpush.msra.mxu3 %v1471_v6 }
 0xc3c   : > { %v1128_v63 = vpop.f32.mrf.mxu1 }
 0xc3d   : > { %1162 = vrot.lane.b32.xlu2 %v1128_v63, %s2169_s20 }
 0xc4a   : > { %v1102_v2 = vpop.f32.mrf.mxu0 }
 0xc4b   : > { %1158 = vrot.lane.b32.xlu0 %v1102_v2, %s2170_s28  ;;  %v1275_v2 = vperm.slane %v1970_v1, 5  ;;  %s1622_s28 = scalar_lea.hbm %s2151_s10, 2 }
 0xc50   : > { %v1154_v3 = vpop.f32.mrf.mxu2 }
 0xc53   : > { %1166 = vrot.lane.b32.xlu0 %v1154_v3, %s2171_s11  ;;  %s1364_s11 = scalar_lea.hbm %s2151_s10, %s1751_s17 }
 0xc54   : > { %s1368_s30 = sshll.u32 %s1364_s11, 4  ;;  %s1369_s30 = int_to_ptr.hbm [resolvable:$true] %s1368_s30 }
 0xc55   : > { %s1616_s18 = sshra.s32 %s1369_s30, 4  ;;  %s1617_s18 = int_to_ptr.hbm [resolvable:$true] %s1616_s18 }
 0xc56   : > { %s1618_s0 = scalar_lea.hbm %s1617_s18, 1  ;;  %p1623_p0 = scmp.lt.s32.totalorder %s1617_s18, %s2151_s10 }
 0xc57   : > { %p1619_p11 = scmp.ne.s32.totalorder %s1617_s18, %s1618_s0  ;;  %p1624_p1 = scmp.lt.s32.totalorder %s1622_s28, %s1618_s0 }
 0xc59   : > { %p1620_p12 = pnand %p1619_p11, %p1768_p5  ;;  %p1625_p2 = por %p1624_p1, %p1623_p0 }
 0xc5b   : > { %v1076_v9 = vpop.f32.mrf.mxu3  ;;  %p1621_p13 = pneg %p1620_p12 }
 0xc5d   : > { %p1626_p3 = pnand %p1625_p2, %p1621_p13 }
 0xc97   : > { %v1163_v11 = vpop.permute.xlu2 %1162 }
 0xcbd   : > { %v1159_v7 = vpop.permute.xlu0 %1158 }
 0xcbe   : > { %v1169_v10 = vsel %vm447_vm5, %v1076_v9, %v1159_v7 }
 0xcbf   : > { %v1170_v12 = vsel %vm711_vm6, %v1169_v10, %v1163_v11 }
 0xcc5   : > { %v1167_v13 = vpop.permute.xlu0 %1166 }
 0xcc6   : > { %v1171_v14 = vsel %vm713_vm7, %v1170_v12, %v1167_v13  ;;  %v1329_v12 = vld [vmem:[%s2149_s8 + $0x18] sm:$0xff]  ;;  %v1328_v13 = vld [vmem:[%s2149_s8 + $0x10] sm:$0xff] }
 0xcc7   : > { %1475 = vmatmul.msk.f32.vlgmr.msra.gmra.mxu3 %vm371_vm0, %v1171_v14  ;;  %1346 = vmatpush.msra.mxu2 %v1329_v12  ;;  %v1327_v14 = vld [vmem:[%s2149_s8 + $0x8] sm:$0xff] }
 0xcc9   : > { %1347 = vmatpush.msra.mxu2 %v1328_v13 }
 0xccb   : > { %1348 = vmatpush.msra.mxu2 %v1327_v14 }
 0xd4a   : > { %v1198_v16 = vpop.f32.mrf.mxu3 }
 0xd4b   : > { %v1199_v17 = vadd.f32 %v1198_v16, %v1177_v15  ;;  %v1326_v15 = vld [vmem:[%s2149_s8] sm:$0xff] }
 0xd4c   : > { %1349 = vmatpush.msra.mxu2 %v1326_v15 }
 0xd4d   : > { %v1201_v18 = vadd.f32 %v1199_v17, %v1963_v0  ;;  %v1478_v0 = vld [vmem:[%s2146_s5 + $0x30] sm:$0xff] }
 0xd4e   : > { %1250 = vmatpush.msra.mxu0 %v1478_v0 }
 0xd4f   : > { %v1202_v19 = vsel %vm371_vm0, %v1201_v18, 0.0 }
 0xd50   : > { %1203 = vadd.xlane.f32.xlu2 %v1202_v19  ;;  %1251 = vmatpush.msra.mxu0 %v1477_v26 }
 0xd52   : > { %1252 = vmatpush.msra.mxu0 %v1476_v27  ;;  %v1324_v27 = vperm.slane %v1970_v1, 7 }
 0xdc3   : > { %v1204_v20 = vpop.xlane.xlu2 %1203 }
 0xdc4   : > { %v1205_v21 = vmul.f32 %v1204_v20, %v1791_v8 }
 0xdc6   : > { %v1206_v22 = vsub.f32 %v1201_v18, %v1205_v21 }
 0xdc8   : > { %v1207_v23 = vmul.f32 %v1206_v22, %v1206_v22 }
 0xdca   : > { %v1208_v24 = vsel %vm371_vm0, %v1207_v23, 0.0 }
 0xdcb   : > { %1209 = vadd.xlane.f32.xlu0 %v1208_v24 }
 0xe3e   : > { %v1210_v28 = vpop.xlane.xlu0 %1209 }
 0xe3f   : > { %v1211_v29 = vmul.f32 %v1210_v28, %v1791_v8 }
 0xe41   : > { %v1212_v30 = vadd.f32 1e-12, %v1211_v29  ;;  %v1330_v29 = vld [vmem:[%s2150_s9] sm:$0x1] }
 0xe43   : > { %1596 = vrsqrt.f32 %v1212_v30  ;;  %vm1219_vm1 = vweird.f32 %v1212_v30 }
 0xe49   : > { %v1597_v31 = vpop.eup %1596 }
 0xe4a   : > { %v1214_v34 = vmul.f32 %v1597_v31, %v1212_v30  ;;  %vm1220_vm15 = vweird.f32 %v1597_v31 }
 0xe4b   : > { %vm1221_vm2 = vmor %vm1219_vm1, %vm1220_vm15 }
 0xe4c   : > { %v1215_v35 = vmul.f32 %v1597_v31, %v1214_v34 }
 0xe4e   : > { %v1216_v36 = vmul.f32 0.5, %v1215_v35 }
 0xe50   : > { %v1217_v44 = vsub.f32 1.5, %v1216_v36 }
 0xe52   : > { %v1218_v37 = vmul.f32 %v1597_v31, %v1217_v44 }
 0xe54   : > { %v1222_v39 = vsel %vm1221_vm2, %v1597_v31, %v1218_v37 }
 0xe55   : > { %v1223_v40 = vmul.f32 %v1222_v39, %v1206_v22 }
 0xe57   : > { %v1225_v42 = vmul.f32 %v1224_v38, %v1223_v40 }
 0xe59   : > { %v1227_v43 = vadd.f32 %v1226_v41, %v1225_v42 }
 0xe5b   : > { %1480 = vmatmul.msk.f32.vlgmr.msra.gmra.mxu0 %vm371_vm0, %v1227_v43 }
 0xed8   : > { %v1254_v54 = vpop.f32.mrf.mxu0 }
 0xed9   : > { %v1255_v55 = vadd.f32 %v1254_v54, %v1233_v53 }
 0xedb   : > { %v1257_v56 = vmul.f32 %v1255_v55, %v1255_v55 }
 0xedd   : > { %v1258_v57 = vmul.f32 %v1257_v56, %v1255_v55 }
 0xedf   : > { %v1259_v58 = vmul.f32 0.044715, %v1258_v57 }
 0xee1   : > { %v1260_v59 = vadd.f32 %v1259_v58, %v1255_v55 }
 0xee3   : > { %v1261_v32 = vmul.f32 0.7978846, %v1260_v59 }
 0xee5   : > { %1598 = vtanh.f32 %v1261_v32 }
 0xeeb   : > { %v1599_v60 = vpop.eup %1598 }
 0xeec   : > { %v1263_v61 = vadd.f32 1.0, %v1599_v60 }
 0xeee   : > { %v1264_v62 = vmul.f32 0.5, %v1263_v61 }
 0xef0   : > { %v1265_v63 = vmul.f32 %v1264_v62, %v1255_v55 }
 0xef2   : > { %1489 = vmatmul.msk.f32.vlgmr.msrb.gmra.mxu1 %vm816_vm11, %v1265_v63 }
 0xf6f   : > { %v1296_v3 = vpop.f32.mrf.mxu1 }
 0xf70   : > { %v1297_v4 = vadd.f32 %v1296_v3, %v1275_v2 }
 0xf72   : > { %v1299_v33 = vadd.f32 %v1297_v4, %v1227_v43 }
 0xf74   : > { %v1300_v5 = vsel %vm371_vm0, %v1299_v33, 0.0 }
 0xf75   : > { %1301 = vadd.xlane.f32.xlu1 %v1300_v5 }
 0xfe8   : > { %v1302_v6 = vpop.xlane.xlu1 %1301 }
 0xfe9   : > { %v1303_v7 = vmul.f32 %v1302_v6, %v1791_v8 }
 0xfeb   : > { %v1304_v9 = vsub.f32 %v1299_v33, %v1303_v7 }
 0xfed   : > { %v1305_v10 = vmul.f32 %v1304_v9, %v1304_v9 }
 0xfef   : > { %v1306_v11 = vsel %vm371_vm0, %v1305_v10, 0.0 }
 0xff0   : > { %1307 = vadd.xlane.f32.xlu2 %v1306_v11 }
0x1063   : > { %v1308_v16 = vpop.xlane.xlu2 %1307 }
0x1064   : > { %v1309_v17 = vmul.f32 %v1308_v16, %v1791_v8 }
0x1066   : > { %v1310_v18 = vadd.f32 1e-12, %v1309_v17 }
0x1068   : > { %1600 = vrsqrt.f32 %v1310_v18  ;;  %vm1317_vm4 = vweird.f32 %v1310_v18 }
0x106e   : > { %v1601_v19 = vpop.eup %1600 }
0x106f   : > { %v1312_v20 = vmul.f32 %v1601_v19, %v1310_v18  ;;  %vm1318_vm3 = vweird.f32 %v1601_v19 }
0x1070   : > { %vm1319_vm5 = vmor %vm1317_vm4, %vm1318_vm3 }
0x1071   : > { %v1313_v21 = vmul.f32 %v1601_v19, %v1312_v20 }
0x1073   : > { %v1314_v22 = vmul.f32 0.5, %v1313_v21 }
0x1075   : > { %v1315_v23 = vsub.f32 1.5, %v1314_v22 }
0x1077   : > { %v1316_v24 = vmul.f32 %v1601_v19, %v1315_v23 }
0x1079   : > { %v1320_v0 = vsel %vm1319_vm5, %v1601_v19, %v1316_v24 }
0x107a   : > { %v1321_v26 = vmul.f32 %v1320_v0, %v1304_v9 }
0x107c   : > { %v1323_v8 = vmul.f32 %v1322_v25, %v1321_v26 }
0x107e   : > { %v1325_v28 = vadd.f32 %v1324_v27, %v1323_v8 }
0x1080   : > { %1490 = vmatmul.msk.f32.vlgmr.msra.gmra.mxu2 %vm371_vm0, %v1325_v28 }
0x1103   : > { %v1351_v30 = vpop.f32.mrf.mxu2 }
0x1104   : > { %v1352_v31 = vadd.f32 %v1351_v30, %v1330_v29 }
0x1106   : > { %1354 = vst [vmem:[%s360_s29] sm:$0x1] %v1352_v31 }
0x1107   : > { %1629 = shalt.err (!%p1626_p3)
}
0x1108   : > { %1493 = dma.vmem_to_hbm [thread:$0]  (%p1768_p5), %s1367_s27, 16, %s1369_s30, %s1356_s26  }
0x1109 PF: > { %p1499_p4 = scmp.ge.s32.totalorder %s1664_s16, 2  ;;  %s1380_s12 = sand.u32 1, %s1652_s13  }
0x110a   : > { %s1381_s11 = scalar_lea.sflag [#allocation3], %s1380_s12 }
0x110b   : > { %p1496_p7 = pnand %p1499_p4, %p1772_p6 }
0x110d   : > { %p1497_p8 = pneg %p1496_p7 }
0x110f   : > { %1647 = dma.done.wait (%p1497_p8), %s1381_s11, 16  }
0x1110   : > { %1649 = vsyncadd (%p1497_p8), %s1381_s11, 4294967280  ;;  %p20_p9 = scmp.ge.s32.totalorder %s1755_s19, 4   ;;  %s2172_s13 = smov %s1656_s14 }
0x1111   : > { %s2173_s14 = smov %s1660_s15  ;;  %s2174_s15 = smov %s1766_s22 }
0x1112   : > { %s2175_s16 = smov %s1755_s19  ;;  %22 = sbr.rel (!%p20_p9) target bundleno = 5 (0x5), region = 103 }
0x1117   :  { %1386 = vsyncpa [#allocation3], 1 }
0x1118   :  { %1388 = vsyncpa [#allocation3 + $0x1], 1 }

</bundles_post_ra>
